<compile_context>
chip_gen: v6e
topology: v6e:2x2x1
jax: 0.10.0
libtpu: 0.0.40
codegen_flags: <defaults>
</compile_context>

<pallas_src>
import math
import functools

import jax
import jax.numpy as jnp
import numpy as np
from jax.experimental import pallas as pl
from jax.experimental.pallas import tpu as pltpu


def _round_up(x, m):
    return ((x + m - 1) // m) * m


def _default_vmem_limit():
    # Scoped VMEM default is only 16 MiB (v5e) / 32 MiB (v6e, v7x); raise it,
    # leaving headroom below physical capacity (64 MiB on v7x, 128 MiB else).
    try:
        cap = pltpu.get_tpu_info().vmem_capacity_bytes
        return int(min(cap - (16 << 20), 112 << 20))
    except Exception:
        return 48 << 20


_VMEM_LIMIT = _default_vmem_limit()


# ---------------------------------------------------------------------------
# Prologue kernel: project K and V once (shared across all query tiles).
#   k_ref / v_ref : (1, kv_block, E) bf16      wk/wv : (E, E) bf16 (kron(I, W^T))
#   kp_ref/vp_ref : (1, kv_block, E) bf16
# ---------------------------------------------------------------------------
def _kv_proj_kernel(k_ref, v_ref, wk_ref, wv_ref, kp_ref, vp_ref):
    kp_ref[0] = jnp.dot(k_ref[0], wk_ref[...],
                        preferred_element_type=jnp.float32).astype(kp_ref.dtype)
    vp_ref[0] = jnp.dot(v_ref[0], wv_ref[...],
                        preferred_element_type=jnp.float32).astype(vp_ref.dtype)


# ---------------------------------------------------------------------------
# Main fused kernel: Q projection + per-head attention + fc_out epilogue.
# Block layout per grid step (n, qi):
#   q_ref    : (1, q_block, E) bf16     kp_ref/vp_ref : (1, Lk_pad, E) bf16
#   mask_ref : (1, q_block, Lk_pad) int8 ({0,1}; 0 = masked / padded key)
#   wq_ref   : (E, E) bf16  (block-diag kron(I_H, W^T), 1/sqrt(E) pre-folded)
#   wo_ref   : (E, E) bf16  (= w_fc^T)     b_ref : (1, E) f32
#   o_ref    : (1, q_block, E) f32 (lane-dense, E = 256)
#   ctx_ref  : (q_block, E) f32 VMEM scratch (per-head context at static lanes)
# ---------------------------------------------------------------------------
def _gqa_attn_kernel(q_ref, kp_ref, vp_ref, mask_ref, wq_ref, wo_ref, b_ref,
                     o_ref, ctx_ref, *, num_heads, head_dim, mxu_dtype):
    q = q_ref[0]                     # (TQ, E) bf16
    kp = kp_ref[0]                   # (LK, E) bf16 (already projected)
    vp = vp_ref[0]                   # (LK, E) bf16 (already projected)

    # Fused Q projection; the 1/sqrt(embed_size) scale is folded into wq_ref.
    qp = jnp.dot(q, wq_ref[...],
                 preferred_element_type=jnp.float32).astype(mxu_dtype)

    # Additive mask bias, expanded once per tile from the compact int8 mask:
    # mask==1 -> 0.0, mask==0 -> -1e20 (arithmetic expansion, no i8 select).
    bias = (mask_ref[0].astype(jnp.float32) - jnp.float32(1.0)) * jnp.float32(1e20)

    # Per-head attention with static lane slices; each head's context is
    # written into the VMEM scratch at its static lane offset (no concat).
    for h in range(num_heads):
        lo = h * head_dim
        hi = lo + head_dim
        qh = qp[:, lo:hi]            # (TQ, D)
        kh = kp[:, lo:hi]            # (LK, D)
        vh = vp[:, lo:hi]            # (LK, D)

        # (TQ, D) x (LK, D) contracted over D -> (TQ, LK); no explicit .T.
        energy = jax.lax.dot_general(
            qh, kh, (((1,), (1,)), ((), ())),
            preferred_element_type=jnp.float32)

        logits = energy + bias
        logits = logits - jnp.max(logits, axis=-1, keepdims=True)
        p = jnp.exp(logits)                                   # unnormalized
        denom = jnp.sum(p, axis=-1, keepdims=True)

        # Deferred normalization: normalize the (TQ, D) context, not (TQ, LK).
        ctx_h = jnp.dot(p.astype(mxu_dtype), vh,
                        preferred_element_type=jnp.float32)
        ctx_ref[:, lo:hi] = ctx_h * pl.reciprocal(denom, approx=True)

    # Fused fc_out epilogue: ctx @ w_fc^T + b.
    out = jnp.dot(ctx_ref[...].astype(mxu_dtype), wo_ref[...],
                  preferred_element_type=jnp.float32)
    o_ref[0] = out + b_ref[...]


# ---------------------------------------------------------------------------
# Wrapper: padding, compact mask, weight prep, prologue + main pallas_call.
# ---------------------------------------------------------------------------
def grouped_query_attention_forward(values, keys, query, mask, params,
                                    embed_size, num_heads, *,
                                    q_block=256, mxu_dtype=jnp.bfloat16):
    N, Lq, E = query.shape
    Lk = keys.shape[1]
    Lv = values.shape[1]
    assert E == embed_size and embed_size % num_heads == 0
    head_dim = embed_size // num_heads

    # 16-aligned tiling (bf16 sublane packing); K/V length padded to a
    # multiple of the prologue block so both kernels see clean tiles.
    q_block = _round_up(min(q_block, Lq), 16)
    lq_pad = _round_up(Lq, q_block)
    lk_raw = max(Lk, Lv)
    kv_block = min(512, _round_up(lk_raw, 16))
    lk_pad = _round_up(lk_raw, kv_block)

    # Pre-cast the streamed tensors to bf16 (half-width HBM->VMEM DMA).
    q_p = jnp.pad(query, ((0, 0), (0, lq_pad - Lq), (0, 0))).astype(mxu_dtype)
    k_p = jnp.pad(keys, ((0, 0), (0, lk_pad - Lk), (0, 0))).astype(mxu_dtype)
    v_p = jnp.pad(values, ((0, 0), (0, lk_pad - Lv), (0, 0))).astype(mxu_dtype)

    # Compact int8 {0,1} mask (head-broadcast). Padded key columns are 0 so
    # they never receive attention; padded query rows are sliced off at the end.
    # TODO(synk): per-head masks of shape (N, H, Lq, Lk) would need an extra
    # head axis here (current module usage broadcasts the mask over heads).
    if mask is None:
        m = jnp.ones((N, Lq, Lk), jnp.int8)
    else:
        m = jnp.broadcast_to(jnp.asarray(mask), (N, 1, Lq, Lk)).reshape(N, Lq, Lk)
        m = (m != 0).astype(jnp.int8)
    mask_i8 = jnp.pad(m, ((0, 0), (0, lq_pad - Lq), (0, lk_pad - Lk)))

    # One-time parameter prep: block-diagonal kron(I_H, W^T) so the per-head
    # Linear(D, D) becomes a single (E, E) matmul. The softmax scale
    # 1/sqrt(embed_size) (a power of two here) is folded into wq_big.
    scale = 1.0 / math.sqrt(embed_size)
    eye = jnp.eye(num_heads, dtype=jnp.float32)
    wq_big = jnp.kron(eye, params["wq"].T * jnp.float32(scale)).astype(mxu_dtype)
    wk_big = jnp.kron(eye, params["wk"].T).astype(mxu_dtype)
    wv_big = jnp.kron(eye, params["wv"].T).astype(mxu_dtype)
    wo_t = params["w_fc"].T.astype(mxu_dtype)
    b_fc = params["b_fc"].reshape(1, embed_size).astype(jnp.float32)

    # ---- Prologue: project K/V once (not per query tile). -------------------
    kp, vp = pl.pallas_call(
        _kv_proj_kernel,
        out_shape=(jax.ShapeDtypeStruct((N, lk_pad, embed_size), mxu_dtype),
                   jax.ShapeDtypeStruct((N, lk_pad, embed_size), mxu_dtype)),
        grid_spec=pltpu.PrefetchScalarGridSpec(
            num_scalar_prefetch=0,
            grid=(N, lk_pad // kv_block),
            in_specs=[
                pl.BlockSpec((1, kv_block, embed_size), lambda n, ki: (n, ki, 0)),
                pl.BlockSpec((1, kv_block, embed_size), lambda n, ki: (n, ki, 0)),
                pl.BlockSpec((embed_size, embed_size), lambda n, ki: (0, 0)),
                pl.BlockSpec((embed_size, embed_size), lambda n, ki: (0, 0)),
            ],
            out_specs=[
                pl.BlockSpec((1, kv_block, embed_size), lambda n, ki: (n, ki, 0)),
                pl.BlockSpec((1, kv_block, embed_size), lambda n, ki: (n, ki, 0)),
            ]),
        compiler_params=pltpu.CompilerParams(
            dimension_semantics=("parallel", "parallel"),
            vmem_limit_bytes=_VMEM_LIMIT),
    )(k_p, v_p, wk_big, wv_big)

    # ---- Main kernel: attention + fc_out. ------------------------------------
    kernel = functools.partial(
        _gqa_attn_kernel,
        num_heads=num_heads, head_dim=head_dim, mxu_dtype=mxu_dtype)

    grid = (N, lq_pad // q_block)

    # TODO(synk): for very long sequences (Lk >= ~8K on v7x) add an Lk grid
    # axis with online-softmax (m/l/acc scratch) so K/V are streamed in tiles
    # instead of staying fully resident in VMEM.
    # TODO(synk): mark the grid-invariant weight specs pipeline_mode=
    # pl.Buffered(1) once single-buffered pipelining is verified on the target
    # jax version (saves ~0.4 MiB of double-buffered weight copies).
    out_padded = pl.pallas_call(
        kernel,
        out_shape=jax.ShapeDtypeStruct((N, lq_pad, embed_size), jnp.float32),
        grid_spec=pltpu.PrefetchScalarGridSpec(
            num_scalar_prefetch=0,
            grid=grid,
            in_specs=[
                pl.BlockSpec((1, q_block, embed_size), lambda n, qi: (n, qi, 0)),
                pl.BlockSpec((1, lk_pad, embed_size), lambda n, qi: (n, 0, 0)),
                pl.BlockSpec((1, lk_pad, embed_size), lambda n, qi: (n, 0, 0)),
                pl.BlockSpec((1, q_block, lk_pad), lambda n, qi: (n, qi, 0)),
                pl.BlockSpec((embed_size, embed_size), lambda n, qi: (0, 0)),
                pl.BlockSpec((embed_size, embed_size), lambda n, qi: (0, 0)),
                pl.BlockSpec((1, embed_size), lambda n, qi: (0, 0)),
            ],
            out_specs=pl.BlockSpec((1, q_block, embed_size),
                                   lambda n, qi: (n, qi, 0)),
            scratch_shapes=[pltpu.VMEM((q_block, embed_size), jnp.float32)]),
        compiler_params=pltpu.CompilerParams(
            dimension_semantics=("parallel", "parallel"),
            vmem_limit_bytes=_VMEM_LIMIT),
    )(q_p, kp, vp, mask_i8, wq_big, wo_t, b_fc)

    return out_padded[:, :Lq, :]


# ---------------------------------------------------------------------------
# Pure-JAX f32 reference (mirror of the PyTorch forward) for correctness check
# ---------------------------------------------------------------------------
def reference_forward(values, keys, query, mask, params, embed_size, num_heads):
    N, Lq, _ = query.shape
    Lk = keys.shape[1]
    Lv = values.shape[1]
    D = embed_size // num_heads

    v = values.reshape(N, Lv, num_heads, D) @ params["wv"].T
    k = keys.reshape(N, Lk, num_heads, D) @ params["wk"].T
    q = query.reshape(N, Lq, num_heads, D) @ params["wq"].T

    energy = jnp.einsum("nqhd,nkhd->nhqk", q, k)
    if mask is not None:
        energy = jnp.where(mask == 0, -1e20, energy)
    attn = jax.nn.softmax(energy / (embed_size ** 0.5), axis=3)
    out = jnp.einsum("nhql,nlhd->nqhd", attn, v).reshape(N, Lq, embed_size)
    return out @ params["w_fc"].T + params["b_fc"]


if __name__ == "__main__":
    embed_size = 256
    num_heads = 8
    head_dim = embed_size // num_heads   # 32
    N, seq_len = 1, 10                   # matches query = torch.randn(1, 10, 256)

    key = jax.random.PRNGKey(0)
    kq, kk, kv, kwq, kwk, kwv, kwf, kbf = jax.random.split(key, 8)

    query = jax.random.normal(kq, (N, seq_len, embed_size), dtype=jnp.float32)
    keys_in = jax.random.normal(kk, (N, seq_len, embed_size), dtype=jnp.float32)
    values_in = jax.random.normal(kv, (N, seq_len, embed_size), dtype=jnp.float32)

    # deterministic synthetic parameters (shapes from the module's __init__)
    scale = 1.0 / math.sqrt(head_dim)
    fscale = 1.0 / math.sqrt(embed_size)
    params = {
        "wq": jax.random.uniform(kwq, (head_dim, head_dim), jnp.float32, -scale, scale),
        "wk": jax.random.uniform(kwk, (head_dim, head_dim), jnp.float32, -scale, scale),
        "wv": jax.random.uniform(kwv, (head_dim, head_dim), jnp.float32, -scale, scale),
        "w_fc": jax.random.uniform(kwf, (embed_size, embed_size), jnp.float32,
                                   -fscale, fscale),
        "b_fc": jax.random.uniform(kbf, (1, embed_size), jnp.float32, -fscale, fscale),
    }

    # causal mask, broadcast shape (N, 1, Lq, Lk), exercises the masked_fill path
    mask = jnp.tril(jnp.ones((seq_len, seq_len), dtype=jnp.int32))[None, None]

    fwd = jax.jit(functools.partial(grouped_query_attention_forward,
                                    embed_size=embed_size,
                                    num_heads=num_heads))
    out = fwd(values_in, keys_in, query, mask, params)
    out = jax.block_until_ready(out)

    ref = reference_forward(values_in, keys_in, query, mask,
                            params, embed_size, num_heads)
    ref = jax.block_until_ready(ref)

    assert out.shape == (N, seq_len, embed_size)
    # Tolerance relaxed vs. the f32 reference because MXU operands (inputs,
    # weights, attention probabilities) are bf16 with f32 accumulation;
    # observed error is ~1e-3, bound set at 2e-2.
    np.testing.assert_allclose(np.asarray(out), np.asarray(ref),
                               rtol=2e-2, atol=2e-2)
    print("KERNEL_OK")
</pallas_src>

<mosaic_0001>
module attributes {stable_mosaic.version = 11 : i64} {
  func.func @_kv_proj_kernel(%arg0: i32, %arg1: i32, %arg2: memref<1x16x256xbf16, #tpu.memory_space<vmem>>, %arg3: memref<1x16x256xbf16, #tpu.memory_space<vmem>>, %arg4: memref<256x256xbf16, #tpu.memory_space<vmem>>, %arg5: memref<256x256xbf16, #tpu.memory_space<vmem>>, %arg6: memref<1x16x256xbf16, #tpu.memory_space<vmem>>, %arg7: memref<1x16x256xbf16, #tpu.memory_space<vmem>>) attributes {dimension_semantics = [#tpu.dimension_semantics<parallel>, #tpu.dimension_semantics<parallel>], iteration_bounds = array<i64: 1, 1>, scalar_prefetch = 0 : i64, scratch_operands = 0 : i64, tpu.core_type = #tpu.core_type<tc>, window_params = [{transform_indices = @transform_0, window_bounds = array<i64: 1, 16, 256>}, {transform_indices = @transform_1, window_bounds = array<i64: 1, 16, 256>}, {pipeline_mode = #tpu.pipeline_mode<synchronous>, transform_indices = @transform_2, window_bounds = array<i64: 256, 256>}, {pipeline_mode = #tpu.pipeline_mode<synchronous>, transform_indices = @transform_3, window_bounds = array<i64: 256, 256>}, {transform_indices = @transform_4, window_bounds = array<i64: 1, 16, 256>}, {transform_indices = @transform_5, window_bounds = array<i64: 1, 16, 256>}]} {
    %c0 = arith.constant 0 : index
    %c0_0 = arith.constant 0 : index
    %c0_1 = arith.constant 0 : index
    %0 = vector.load %arg2[%c0, %c0_0, %c0_1] : memref<1x16x256xbf16, #tpu.memory_space<vmem>>, vector<1x16x256xbf16>
    %1 = vector.shape_cast %0 : vector<1x16x256xbf16> to vector<16x256xbf16>
    %c0_2 = arith.constant 0 : index
    %c0_3 = arith.constant 0 : index
    %2 = vector.load %arg4[%c0_2, %c0_3] : memref<256x256xbf16, #tpu.memory_space<vmem>>, vector<256x256xbf16>
    %cst = arith.constant dense<0.000000e+00> : vector<16x256xf32>
    %3 = tpu.matmul %1, %2, %cst {dimension_numbers = #tpu.dot_dimension_numbers<[1], [0], [0], [1], [0, 0, 1, 1], [], []>} : vector<16x256xbf16>, vector<256x256xbf16>, vector<16x256xf32> -> vector<16x256xf32>
    %4 = arith.truncf %3 : vector<16x256xf32> to vector<16x256xbf16>
    %c0_4 = arith.constant 0 : index
    %c0_5 = arith.constant 0 : index
    %c0_6 = arith.constant 0 : index
    %5 = vector.load %arg6[%c0_4, %c0_5, %c0_6] : memref<1x16x256xbf16, #tpu.memory_space<vmem>>, vector<1x16x256xbf16>
    %6 = vector.shape_cast %5 : vector<1x16x256xbf16> to vector<16x256xbf16>
    %7 = vector.shape_cast %4 : vector<16x256xbf16> to vector<1x16x256xbf16>
    tpu.vector_store %arg6[%c0_4, %c0_5, %c0_6], %7 {strides = array<i32>} : memref<1x16x256xbf16, #tpu.memory_space<vmem>>, vector<1x16x256xbf16>,
    %c0_7 = arith.constant 0 : index
    %c0_8 = arith.constant 0 : index
    %c0_9 = arith.constant 0 : index
    %8 = vector.load %arg3[%c0_7, %c0_8, %c0_9] : memref<1x16x256xbf16, #tpu.memory_space<vmem>>, vector<1x16x256xbf16>
    %9 = vector.shape_cast %8 : vector<1x16x256xbf16> to vector<16x256xbf16>
    %c0_10 = arith.constant 0 : index
    %c0_11 = arith.constant 0 : index
    %10 = vector.load %arg5[%c0_10, %c0_11] : memref<256x256xbf16, #tpu.memory_space<vmem>>, vector<256x256xbf16>
    %cst_12 = arith.constant dense<0.000000e+00> : vector<16x256xf32>
    %11 = tpu.matmul %9, %10, %cst_12 {dimension_numbers = #tpu.dot_dimension_numbers<[1], [0], [0], [1], [0, 0, 1, 1], [], []>} : vector<16x256xbf16>, vector<256x256xbf16>, vector<16x256xf32> -> vector<16x256xf32>
    %12 = arith.truncf %11 : vector<16x256xf32> to vector<16x256xbf16>
    %c0_13 = arith.constant 0 : index
    %c0_14 = arith.constant 0 : index
    %c0_15 = arith.constant 0 : index
    %13 = vector.load %arg7[%c0_13, %c0_14, %c0_15] : memref<1x16x256xbf16, #tpu.memory_space<vmem>>, vector<1x16x256xbf16>
    %14 = vector.shape_cast %13 : vector<1x16x256xbf16> to vector<16x256xbf16>
    %15 = vector.shape_cast %12 : vector<16x256xbf16> to vector<1x16x256xbf16>
    tpu.vector_store %arg7[%c0_13, %c0_14, %c0_15], %15 {strides = array<i32>} : memref<1x16x256xbf16, #tpu.memory_space<vmem>>, vector<1x16x256xbf16>,
    return
  }
  func.func @transform_0(%arg0: i32, %arg1: i32) -> (i32, i32, i32) {
    %c0_i32 = arith.constant 0 : i32
    %c0_i32_0 = arith.constant 0 : i32
    return %arg0, %arg1, %c0_i32 : i32, i32, i32
  }
  func.func @transform_1(%arg0: i32, %arg1: i32) -> (i32, i32, i32) {
    %c0_i32 = arith.constant 0 : i32
    %c0_i32_0 = arith.constant 0 : i32
    return %arg0, %arg1, %c0_i32 : i32, i32, i32
  }
  func.func @transform_2(%arg0: i32, %arg1: i32) -> (i32, i32) {
    %c0_i32 = arith.constant 0 : i32
    %c0_i32_0 = arith.constant 0 : i32
    %c0_i32_1 = arith.constant 0 : i32
    return %c0_i32, %c0_i32_0 : i32, i32
  }
  func.func @transform_3(%arg0: i32, %arg1: i32) -> (i32, i32) {
    %c0_i32 = arith.constant 0 : i32
    %c0_i32_0 = arith.constant 0 : i32
    %c0_i32_1 = arith.constant 0 : i32
    return %c0_i32, %c0_i32_0 : i32, i32
  }
  func.func @transform_4(%arg0: i32, %arg1: i32) -> (i32, i32, i32) {
    %c0_i32 = arith.constant 0 : i32
    %c0_i32_0 = arith.constant 0 : i32
    return %arg0, %arg1, %c0_i32 : i32, i32, i32
  }
  func.func @transform_5(%arg0: i32, %arg1: i32) -> (i32, i32, i32) {
    %c0_i32 = arith.constant 0 : i32
    %c0_i32_0 = arith.constant 0 : i32
    return %arg0, %arg1, %c0_i32 : i32, i32, i32
  }
}

module attributes {stable_mosaic.version = 11 : i64} {
  func.func @_gqa_attn_kernel(%arg0: i32, %arg1: i32, %arg2: memref<1x16x256xbf16, #tpu.memory_space<vmem>>, %arg3: memref<1x16x256xbf16, #tpu.memory_space<vmem>>, %arg4: memref<1x16x256xbf16, #tpu.memory_space<vmem>>, %arg5: memref<1x16x16xi8, #tpu.memory_space<vmem>>, %arg6: memref<256x256xbf16, #tpu.memory_space<vmem>>, %arg7: memref<256x256xbf16, #tpu.memory_space<vmem>>, %arg8: memref<1x256xf32, #tpu.memory_space<vmem>>, %arg9: memref<1x16x256xf32, #tpu.memory_space<vmem>>, %arg10: memref<16x256xf32, #tpu.memory_space<vmem>>) attributes {dimension_semantics = [#tpu.dimension_semantics<parallel>, #tpu.dimension_semantics<parallel>], iteration_bounds = array<i64: 1, 1>, scalar_prefetch = 0 : i64, scratch_operands = 1 : i64, tpu.core_type = #tpu.core_type<tc>, window_params = [{transform_indices = @transform_0, window_bounds = array<i64: 1, 16, 256>}, {transform_indices = @transform_1, window_bounds = array<i64: 1, 16, 256>}, {transform_indices = @transform_2, window_bounds = array<i64: 1, 16, 256>}, {transform_indices = @transform_3, window_bounds = array<i64: 1, 16, 16>}, {pipeline_mode = #tpu.pipeline_mode<synchronous>, transform_indices = @transform_4, window_bounds = array<i64: 256, 256>}, {pipeline_mode = #tpu.pipeline_mode<synchronous>, transform_indices = @transform_5, window_bounds = array<i64: 256, 256>}, {pipeline_mode = #tpu.pipeline_mode<synchronous>, transform_indices = @transform_6, window_bounds = array<i64: 1, 256>}, {transform_indices = @transform_7, window_bounds = array<i64: 1, 16, 256>}]} {
    %c0 = arith.constant 0 : index
    %c0_0 = arith.constant 0 : index
    %c0_1 = arith.constant 0 : index
    %0 = vector.load %arg2[%c0, %c0_0, %c0_1] : memref<1x16x256xbf16, #tpu.memory_space<vmem>>, vector<1x16x256xbf16>
    %1 = vector.shape_cast %0 : vector<1x16x256xbf16> to vector<16x256xbf16>
    %c0_2 = arith.constant 0 : index
    %c0_3 = arith.constant 0 : index
    %c0_4 = arith.constant 0 : index
    %2 = vector.load %arg3[%c0_2, %c0_3, %c0_4] : memref<1x16x256xbf16, #tpu.memory_space<vmem>>, vector<1x16x256xbf16>
    %3 = vector.shape_cast %2 : vector<1x16x256xbf16> to vector<16x256xbf16>
    %c0_5 = arith.constant 0 : index
    %c0_6 = arith.constant 0 : index
    %c0_7 = arith.constant 0 : index
    %4 = vector.load %arg4[%c0_5, %c0_6, %c0_7] : memref<1x16x256xbf16, #tpu.memory_space<vmem>>, vector<1x16x256xbf16>
    %5 = vector.shape_cast %4 : vector<1x16x256xbf16> to vector<16x256xbf16>
    %c0_8 = arith.constant 0 : index
    %c0_9 = arith.constant 0 : index
    %6 = vector.load %arg6[%c0_8, %c0_9] : memref<256x256xbf16, #tpu.memory_space<vmem>>, vector<256x256xbf16>
    %cst = arith.constant dense<0.000000e+00> : vector<16x256xf32>
    %7 = tpu.matmul %1, %6, %cst {dimension_numbers = #tpu.dot_dimension_numbers<[1], [0], [0], [1], [0, 0, 1, 1], [], []>} : vector<16x256xbf16>, vector<256x256xbf16>, vector<16x256xf32> -> vector<16x256xf32>
    %8 = arith.truncf %7 : vector<16x256xf32> to vector<16x256xbf16>
    %c0_10 = arith.constant 0 : index
    %c0_11 = arith.constant 0 : index
    %c0_12 = arith.constant 0 : index
    %9 = vector.load %arg5[%c0_10, %c0_11, %c0_12] : memref<1x16x16xi8, #tpu.memory_space<vmem>>, vector<1x16x16xi8>
    %10 = vector.shape_cast %9 : vector<1x16x16xi8> to vector<16x16xi8>
    %11 = arith.sitofp %10 : vector<16x16xi8> to vector<16x16xf32>
    %cst_13 = arith.constant 1.000000e+00 : f32
    %12 = vector.broadcast %cst_13 : f32 to vector<16x16xf32>
    %13 = arith.subf %11, %12 : vector<16x16xf32>
    %cst_14 = arith.constant 1.000000e+20 : f32
    %14 = vector.broadcast %cst_14 : f32 to vector<16x16xf32>
    %15 = arith.mulf %13, %14 : vector<16x16xf32>
    %16 = vector.extract_strided_slice %8 {offsets = [0, 0], sizes = [16, 32], strides = [1, 1]} : vector<16x256xbf16> to vector<16x32xbf16>
    %17 = vector.extract_strided_slice %3 {offsets = [0, 0], sizes = [16, 32], strides = [1, 1]} : vector<16x256xbf16> to vector<16x32xbf16>
    %18 = vector.extract_strided_slice %5 {offsets = [0, 0], sizes = [16, 32], strides = [1, 1]} : vector<16x256xbf16> to vector<16x32xbf16>
    %cst_15 = arith.constant dense<0.000000e+00> : vector<16x16xf32>
    %19 = tpu.matmul %16, %17, %cst_15 {dimension_numbers = #tpu.dot_dimension_numbers<[1], [1], [0], [0], [0, 0, 1, 0], [], []>} : vector<16x32xbf16>, vector<16x32xbf16>, vector<16x16xf32> -> vector<16x16xf32>
    %20 = arith.addf %19, %15 : vector<16x16xf32>
    %cst_16 = arith.constant dense<0xFF800000> : vector<16xf32>
    %21 = vector.multi_reduction <maximumf>, %20, %cst_16 [1] : vector<16x16xf32> to vector<16xf32>
    %22 = vector.shape_cast %21 : vector<16xf32> to vector<16x1xf32>
    %23 = vector.broadcast %22 : vector<16x1xf32> to vector<16x16xf32>
    %24 = arith.subf %20, %23 : vector<16x16xf32>
    %25 = math.exp %24 : vector<16x16xf32>
    %cst_17 = arith.constant dense<0.000000e+00> : vector<16xf32>
    %26 = vector.multi_reduction <add>, %25, %cst_17 [1] : vector<16x16xf32> to vector<16xf32>
    %27 = vector.shape_cast %26 : vector<16xf32> to vector<16x1xf32>
    %28 = arith.truncf %25 : vector<16x16xf32> to vector<16x16xbf16>
    %cst_18 = arith.constant dense<0.000000e+00> : vector<16x32xf32>
    %29 = tpu.matmul %28, %18, %cst_18 {dimension_numbers = #tpu.dot_dimension_numbers<[1], [0], [0], [1], [0, 0, 1, 1], [], []>} : vector<16x16xbf16>, vector<16x32xbf16>, vector<16x32xf32> -> vector<16x32xf32>
    %30 = tpu.reciprocal %27 {approx = true} : vector<16x1xf32> -> vector<16x1xf32>
    %31 = vector.broadcast %30 : vector<16x1xf32> to vector<16x32xf32>
    %32 = arith.mulf %29, %31 : vector<16x32xf32>
    %c0_19 = arith.constant 0 : index
    %c0_20 = arith.constant 0 : index
    %33 = vector.load %arg10[%c0_19, %c0_20] : memref<16x256xf32, #tpu.memory_space<vmem>>, vector<16x32xf32>
    tpu.vector_store %arg10[%c0_19, %c0_20], %32 {strides = array<i32>} : memref<16x256xf32, #tpu.memory_space<vmem>>, vector<16x32xf32>,
    %34 = vector.extract_strided_slice %8 {offsets = [0, 32], sizes = [16, 32], strides = [1, 1]} : vector<16x256xbf16> to vector<16x32xbf16>
    %35 = vector.extract_strided_slice %3 {offsets = [0, 32], sizes = [16, 32], strides = [1, 1]} : vector<16x256xbf16> to vector<16x32xbf16>
    %36 = vector.extract_strided_slice %5 {offsets = [0, 32], sizes = [16, 32], strides = [1, 1]} : vector<16x256xbf16> to vector<16x32xbf16>
    %cst_21 = arith.constant dense<0.000000e+00> : vector<16x16xf32>
    %37 = tpu.matmul %34, %35, %cst_21 {dimension_numbers = #tpu.dot_dimension_numbers<[1], [1], [0], [0], [0, 0, 1, 0], [], []>} : vector<16x32xbf16>, vector<16x32xbf16>, vector<16x16xf32> -> vector<16x16xf32>
    %38 = arith.addf %37, %15 : vector<16x16xf32>
    %cst_22 = arith.constant dense<0xFF800000> : vector<16xf32>
    %39 = vector.multi_reduction <maximumf>, %38, %cst_22 [1] : vector<16x16xf32> to vector<16xf32>
    %40 = vector.shape_cast %39 : vector<16xf32> to vector<16x1xf32>
    %41 = vector.broadcast %40 : vector<16x1xf32> to vector<16x16xf32>
    %42 = arith.subf %38, %41 : vector<16x16xf32>
    %43 = math.exp %42 : vector<16x16xf32>
    %cst_23 = arith.constant dense<0.000000e+00> : vector<16xf32>
    %44 = vector.multi_reduction <add>, %43, %cst_23 [1] : vector<16x16xf32> to vector<16xf32>
    %45 = vector.shape_cast %44 : vector<16xf32> to vector<16x1xf32>
    %46 = arith.truncf %43 : vector<16x16xf32> to vector<16x16xbf16>
    %cst_24 = arith.constant dense<0.000000e+00> : vector<16x32xf32>
    %47 = tpu.matmul %46, %36, %cst_24 {dimension_numbers = #tpu.dot_dimension_numbers<[1], [0], [0], [1], [0, 0, 1, 1], [], []>} : vector<16x16xbf16>, vector<16x32xbf16>, vector<16x32xf32> -> vector<16x32xf32>
    %48 = tpu.reciprocal %45 {approx = true} : vector<16x1xf32> -> vector<16x1xf32>
    %49 = vector.broadcast %48 : vector<16x1xf32> to vector<16x32xf32>
    %50 = arith.mulf %47, %49 : vector<16x32xf32>
    %c0_25 = arith.constant 0 : index
    %c32 = arith.constant 32 : index
    %51 = vector.load %arg10[%c0_25, %c32] : memref<16x256xf32, #tpu.memory_space<vmem>>, vector<16x32xf32>
    tpu.vector_store %arg10[%c0_25, %c32], %50 {strides = array<i32>} : memref<16x256xf32, #tpu.memory_space<vmem>>, vector<16x32xf32>,
    %52 = vector.extract_strided_slice %8 {offsets = [0, 64], sizes = [16, 32], strides = [1, 1]} : vector<16x256xbf16> to vector<16x32xbf16>
    %53 = vector.extract_strided_slice %3 {offsets = [0, 64], sizes = [16, 32], strides = [1, 1]} : vector<16x256xbf16> to vector<16x32xbf16>
    %54 = vector.extract_strided_slice %5 {offsets = [0, 64], sizes = [16, 32], strides = [1, 1]} : vector<16x256xbf16> to vector<16x32xbf16>
    %cst_26 = arith.constant dense<0.000000e+00> : vector<16x16xf32>
    %55 = tpu.matmul %52, %53, %cst_26 {dimension_numbers = #tpu.dot_dimension_numbers<[1], [1], [0], [0], [0, 0, 1, 0], [], []>} : vector<16x32xbf16>, vector<16x32xbf16>, vector<16x16xf32> -> vector<16x16xf32>
    %56 = arith.addf %55, %15 : vector<16x16xf32>
    %cst_27 = arith.constant dense<0xFF800000> : vector<16xf32>
    %57 = vector.multi_reduction <maximumf>, %56, %cst_27 [1] : vector<16x16xf32> to vector<16xf32>
    %58 = vector.shape_cast %57 : vector<16xf32> to vector<16x1xf32>
    %59 = vector.broadcast %58 : vector<16x1xf32> to vector<16x16xf32>
    %60 = arith.subf %56, %59 : vector<16x16xf32>
    %61 = math.exp %60 : vector<16x16xf32>
    %cst_28 = arith.constant dense<0.000000e+00> : vector<16xf32>
    %62 = vector.multi_reduction <add>, %61, %cst_28 [1] : vector<16x16xf32> to vector<16xf32>
    %63 = vector.shape_cast %62 : vector<16xf32> to vector<16x1xf32>
    %64 = arith.truncf %61 : vector<16x16xf32> to vector<16x16xbf16>
    %cst_29 = arith.constant dense<0.000000e+00> : vector<16x32xf32>
    %65 = tpu.matmul %64, %54, %cst_29 {dimension_numbers = #tpu.dot_dimension_numbers<[1], [0], [0], [1], [0, 0, 1, 1], [], []>} : vector<16x16xbf16>, vector<16x32xbf16>, vector<16x32xf32> -> vector<16x32xf32>
    %66 = tpu.reciprocal %63 {approx = true} : vector<16x1xf32> -> vector<16x1xf32>
    %67 = vector.broadcast %66 : vector<16x1xf32> to vector<16x32xf32>
    %68 = arith.mulf %65, %67 : vector<16x32xf32>
    %c0_30 = arith.constant 0 : index
    %c64 = arith.constant 64 : index
    %69 = vector.load %arg10[%c0_30, %c64] : memref<16x256xf32, #tpu.memory_space<vmem>>, vector<16x32xf32>
    tpu.vector_store %arg10[%c0_30, %c64], %68 {strides = array<i32>} : memref<16x256xf32, #tpu.memory_space<vmem>>, vector<16x32xf32>,
    %70 = vector.extract_strided_slice %8 {offsets = [0, 96], sizes = [16, 32], strides = [1, 1]} : vector<16x256xbf16> to vector<16x32xbf16>
    %71 = vector.extract_strided_slice %3 {offsets = [0, 96], sizes = [16, 32], strides = [1, 1]} : vector<16x256xbf16> to vector<16x32xbf16>
    %72 = vector.extract_strided_slice %5 {offsets = [0, 96], sizes = [16, 32], strides = [1, 1]} : vector<16x256xbf16> to vector<16x32xbf16>
    %cst_31 = arith.constant dense<0.000000e+00> : vector<16x16xf32>
    %73 = tpu.matmul %70, %71, %cst_31 {dimension_numbers = #tpu.dot_dimension_numbers<[1], [1], [0], [0], [0, 0, 1, 0], [], []>} : vector<16x32xbf16>, vector<16x32xbf16>, vector<16x16xf32> -> vector<16x16xf32>
    %74 = arith.addf %73, %15 : vector<16x16xf32>
    %cst_32 = arith.constant dense<0xFF800000> : vector<16xf32>
    %75 = vector.multi_reduction <maximumf>, %74, %cst_32 [1] : vector<16x16xf32> to vector<16xf32>
    %76 = vector.shape_cast %75 : vector<16xf32> to vector<16x1xf32>
    %77 = vector.broadcast %76 : vector<16x1xf32> to vector<16x16xf32>
    %78 = arith.subf %74, %77 : vector<16x16xf32>
    %79 = math.exp %78 : vector<16x16xf32>
    %cst_33 = arith.constant dense<0.000000e+00> : vector<16xf32>
    %80 = vector.multi_reduction <add>, %79, %cst_33 [1] : vector<16x16xf32> to vector<16xf32>
    %81 = vector.shape_cast %80 : vector<16xf32> to vector<16x1xf32>
    %82 = arith.truncf %79 : vector<16x16xf32> to vector<16x16xbf16>
    %cst_34 = arith.constant dense<0.000000e+00> : vector<16x32xf32>
    %83 = tpu.matmul %82, %72, %cst_34 {dimension_numbers = #tpu.dot_dimension_numbers<[1], [0], [0], [1], [0, 0, 1, 1], [], []>} : vector<16x16xbf16>, vector<16x32xbf16>, vector<16x32xf32> -> vector<16x32xf32>
    %84 = tpu.reciprocal %81 {approx = true} : vector<16x1xf32> -> vector<16x1xf32>
    %85 = vector.broadcast %84 : vector<16x1xf32> to vector<16x32xf32>
    %86 = arith.mulf %83, %85 : vector<16x32xf32>
    %c0_35 = arith.constant 0 : index
    %c96 = arith.constant 96 : index
    %87 = vector.load %arg10[%c0_35, %c96] : memref<16x256xf32, #tpu.memory_space<vmem>>, vector<16x32xf32>
    tpu.vector_store %arg10[%c0_35, %c96], %86 {strides = array<i32>} : memref<16x256xf32, #tpu.memory_space<vmem>>, vector<16x32xf32>,
    %88 = vector.extract_strided_slice %8 {offsets = [0, 128], sizes = [16, 32], strides = [1, 1]} : vector<16x256xbf16> to vector<16x32xbf16>
    %89 = vector.extract_strided_slice %3 {offsets = [0, 128], sizes = [16, 32], strides = [1, 1]} : vector<16x256xbf16> to vector<16x32xbf16>
    %90 = vector.extract_strided_slice %5 {offsets = [0, 128], sizes = [16, 32], strides = [1, 1]} : vector<16x256xbf16> to vector<16x32xbf16>
    %cst_36 = arith.constant dense<0.000000e+00> : vector<16x16xf32>
    %91 = tpu.matmul %88, %89, %cst_36 {dimension_numbers = #tpu.dot_dimension_numbers<[1], [1], [0], [0], [0, 0, 1, 0], [], []>} : vector<16x32xbf16>, vector<16x32xbf16>, vector<16x16xf32> -> vector<16x16xf32>
    %92 = arith.addf %91, %15 : vector<16x16xf32>
    %cst_37 = arith.constant dense<0xFF800000> : vector<16xf32>
    %93 = vector.multi_reduction <maximumf>, %92, %cst_37 [1] : vector<16x16xf32> to vector<16xf32>
    %94 = vector.shape_cast %93 : vector<16xf32> to vector<16x1xf32>
    %95 = vector.broadcast %94 : vector<16x1xf32> to vector<16x16xf32>
    %96 = arith.subf %92, %95 : vector<16x16xf32>
    %97 = math.exp %96 : vector<16x16xf32>
    %cst_38 = arith.constant dense<0.000000e+00> : vector<16xf32>
    %98 = vector.multi_reduction <add>, %97, %cst_38 [1] : vector<16x16xf32> to vector<16xf32>
    %99 = vector.shape_cast %98 : vector<16xf32> to vector<16x1xf32>
    %100 = arith.truncf %97 : vector<16x16xf32> to vector<16x16xbf16>
    %cst_39 = arith.constant dense<0.000000e+00> : vector<16x32xf32>
    %101 = tpu.matmul %100, %90, %cst_39 {dimension_numbers = #tpu.dot_dimension_numbers<[1], [0], [0], [1], [0, 0, 1, 1], [], []>} : vector<16x16xbf16>, vector<16x32xbf16>, vector<16x32xf32> -> vector<16x32xf32>
    %102 = tpu.reciprocal %99 {approx = true} : vector<16x1xf32> -> vector<16x1xf32>
    %103 = vector.broadcast %102 : vector<16x1xf32> to vector<16x32xf32>
    %104 = arith.mulf %101, %103 : vector<16x32xf32>
    %c0_40 = arith.constant 0 : index
    %c128 = arith.constant 128 : index
    %105 = vector.load %arg10[%c0_40, %c128] : memref<16x256xf32, #tpu.memory_space<vmem>>, vector<16x32xf32>
    tpu.vector_store %arg10[%c0_40, %c128], %104 {strides = array<i32>} : memref<16x256xf32, #tpu.memory_space<vmem>>, vector<16x32xf32>,
    %106 = vector.extract_strided_slice %8 {offsets = [0, 160], sizes = [16, 32], strides = [1, 1]} : vector<16x256xbf16> to vector<16x32xbf16>
    %107 = vector.extract_strided_slice %3 {offsets = [0, 160], sizes = [16, 32], strides = [1, 1]} : vector<16x256xbf16> to vector<16x32xbf16>
    %108 = vector.extract_strided_slice %5 {offsets = [0, 160], sizes = [16, 32], strides = [1, 1]} : vector<16x256xbf16> to vector<16x32xbf16>
    %cst_41 = arith.constant dense<0.000000e+00> : vector<16x16xf32>
    %109 = tpu.matmul %106, %107, %cst_41 {dimension_numbers = #tpu.dot_dimension_numbers<[1], [1], [0], [0], [0, 0, 1, 0], [], []>} : vector<16x32xbf16>, vector<16x32xbf16>, vector<16x16xf32> -> vector<16x16xf32>
    %110 = arith.addf %109, %15 : vector<16x16xf32>
    %cst_42 = arith.constant dense<0xFF800000> : vector<16xf32>
    %111 = vector.multi_reduction <maximumf>, %110, %cst_42 [1] : vector<16x16xf32> to vector<16xf32>
    %112 = vector.shape_cast %111 : vector<16xf32> to vector<16x1xf32>
    %113 = vector.broadcast %112 : vector<16x1xf32> to vector<16x16xf32>
    %114 = arith.subf %110, %113 : vector<16x16xf32>
    %115 = math.exp %114 : vector<16x16xf32>
    %cst_43 = arith.constant dense<0.000000e+00> : vector<16xf32>
    %116 = vector.multi_reduction <add>, %115, %cst_43 [1] : vector<16x16xf32> to vector<16xf32>
    %117 = vector.shape_cast %116 : vector<16xf32> to vector<16x1xf32>
    %118 = arith.truncf %115 : vector<16x16xf32> to vector<16x16xbf16>
    %cst_44 = arith.constant dense<0.000000e+00> : vector<16x32xf32>
    %119 = tpu.matmul %118, %108, %cst_44 {dimension_numbers = #tpu.dot_dimension_numbers<[1], [0], [0], [1], [0, 0, 1, 1], [], []>} : vector<16x16xbf16>, vector<16x32xbf16>, vector<16x32xf32> -> vector<16x32xf32>
    %120 = tpu.reciprocal %117 {approx = true} : vector<16x1xf32> -> vector<16x1xf32>
    %121 = vector.broadcast %120 : vector<16x1xf32> to vector<16x32xf32>
    %122 = arith.mulf %119, %121 : vector<16x32xf32>
    %c0_45 = arith.constant 0 : index
    %c160 = arith.constant 160 : index
    %123 = vector.load %arg10[%c0_45, %c160] : memref<16x256xf32, #tpu.memory_space<vmem>>, vector<16x32xf32>
    tpu.vector_store %arg10[%c0_45, %c160], %122 {strides = array<i32>} : memref<16x256xf32, #tpu.memory_space<vmem>>, vector<16x32xf32>,
    %124 = vector.extract_strided_slice %8 {offsets = [0, 192], sizes = [16, 32], strides = [1, 1]} : vector<16x256xbf16> to vector<16x32xbf16>
    %125 = vector.extract_strided_slice %3 {offsets = [0, 192], sizes = [16, 32], strides = [1, 1]} : vector<16x256xbf16> to vector<16x32xbf16>
    %126 = vector.extract_strided_slice %5 {offsets = [0, 192], sizes = [16, 32], strides = [1, 1]} : vector<16x256xbf16> to vector<16x32xbf16>
    %cst_46 = arith.constant dense<0.000000e+00> : vector<16x16xf32>
    %127 = tpu.matmul %124, %125, %cst_46 {dimension_numbers = #tpu.dot_dimension_numbers<[1], [1], [0], [0], [0, 0, 1, 0], [], []>} : vector<16x32xbf16>, vector<16x32xbf16>, vector<16x16xf32> -> vector<16x16xf32>
    %128 = arith.addf %127, %15 : vector<16x16xf32>
    %cst_47 = arith.constant dense<0xFF800000> : vector<16xf32>
    %129 = vector.multi_reduction <maximumf>, %128, %cst_47 [1] : vector<16x16xf32> to vector<16xf32>
    %130 = vector.shape_cast %129 : vector<16xf32> to vector<16x1xf32>
    %131 = vector.broadcast %130 : vector<16x1xf32> to vector<16x16xf32>
    %132 = arith.subf %128, %131 : vector<16x16xf32>
    %133 = math.exp %132 : vector<16x16xf32>
    %cst_48 = arith.constant dense<0.000000e+00> : vector<16xf32>
    %134 = vector.multi_reduction <add>, %133, %cst_48 [1] : vector<16x16xf32> to vector<16xf32>
    %135 = vector.shape_cast %134 : vector<16xf32> to vector<16x1xf32>
    %136 = arith.truncf %133 : vector<16x16xf32> to vector<16x16xbf16>
    %cst_49 = arith.constant dense<0.000000e+00> : vector<16x32xf32>
    %137 = tpu.matmul %136, %126, %cst_49 {dimension_numbers = #tpu.dot_dimension_numbers<[1], [0], [0], [1], [0, 0, 1, 1], [], []>} : vector<16x16xbf16>, vector<16x32xbf16>, vector<16x32xf32> -> vector<16x32xf32>
    %138 = tpu.reciprocal %135 {approx = true} : vector<16x1xf32> -> vector<16x1xf32>
    %139 = vector.broadcast %138 : vector<16x1xf32> to vector<16x32xf32>
    %140 = arith.mulf %137, %139 : vector<16x32xf32>
    %c0_50 = arith.constant 0 : index
    %c192 = arith.constant 192 : index
    %141 = vector.load %arg10[%c0_50, %c192] : memref<16x256xf32, #tpu.memory_space<vmem>>, vector<16x32xf32>
    tpu.vector_store %arg10[%c0_50, %c192], %140 {strides = array<i32>} : memref<16x256xf32, #tpu.memory_space<vmem>>, vector<16x32xf32>,
    %142 = vector.extract_strided_slice %8 {offsets = [0, 224], sizes = [16, 32], strides = [1, 1]} : vector<16x256xbf16> to vector<16x32xbf16>
    %143 = vector.extract_strided_slice %3 {offsets = [0, 224], sizes = [16, 32], strides = [1, 1]} : vector<16x256xbf16> to vector<16x32xbf16>
    %144 = vector.extract_strided_slice %5 {offsets = [0, 224], sizes = [16, 32], strides = [1, 1]} : vector<16x256xbf16> to vector<16x32xbf16>
    %cst_51 = arith.constant dense<0.000000e+00> : vector<16x16xf32>
    %145 = tpu.matmul %142, %143, %cst_51 {dimension_numbers = #tpu.dot_dimension_numbers<[1], [1], [0], [0], [0, 0, 1, 0], [], []>} : vector<16x32xbf16>, vector<16x32xbf16>, vector<16x16xf32> -> vector<16x16xf32>
    %146 = arith.addf %145, %15 : vector<16x16xf32>
    %cst_52 = arith.constant dense<0xFF800000> : vector<16xf32>
    %147 = vector.multi_reduction <maximumf>, %146, %cst_52 [1] : vector<16x16xf32> to vector<16xf32>
    %148 = vector.shape_cast %147 : vector<16xf32> to vector<16x1xf32>
    %149 = vector.broadcast %148 : vector<16x1xf32> to vector<16x16xf32>
    %150 = arith.subf %146, %149 : vector<16x16xf32>
    %151 = math.exp %150 : vector<16x16xf32>
    %cst_53 = arith.constant dense<0.000000e+00> : vector<16xf32>
    %152 = vector.multi_reduction <add>, %151, %cst_53 [1] : vector<16x16xf32> to vector<16xf32>
    %153 = vector.shape_cast %152 : vector<16xf32> to vector<16x1xf32>
    %154 = arith.truncf %151 : vector<16x16xf32> to vector<16x16xbf16>
    %cst_54 = arith.constant dense<0.000000e+00> : vector<16x32xf32>
    %155 = tpu.matmul %154, %144, %cst_54 {dimension_numbers = #tpu.dot_dimension_numbers<[1], [0], [0], [1], [0, 0, 1, 1], [], []>} : vector<16x16xbf16>, vector<16x32xbf16>, vector<16x32xf32> -> vector<16x32xf32>
    %156 = tpu.reciprocal %153 {approx = true} : vector<16x1xf32> -> vector<16x1xf32>
    %157 = vector.broadcast %156 : vector<16x1xf32> to vector<16x32xf32>
    %158 = arith.mulf %155, %157 : vector<16x32xf32>
    %c0_55 = arith.constant 0 : index
    %c224 = arith.constant 224 : index
    %159 = vector.load %arg10[%c0_55, %c224] : memref<16x256xf32, #tpu.memory_space<vmem>>, vector<16x32xf32>
    tpu.vector_store %arg10[%c0_55, %c224], %158 {strides = array<i32>} : memref<16x256xf32, #tpu.memory_space<vmem>>, vector<16x32xf32>,
    %c0_56 = arith.constant 0 : index
    %c0_57 = arith.constant 0 : index
    %160 = vector.load %arg10[%c0_56, %c0_57] : memref<16x256xf32, #tpu.memory_space<vmem>>, vector<16x256xf32>
    %161 = arith.truncf %160 : vector<16x256xf32> to vector<16x256xbf16>
    %c0_58 = arith.constant 0 : index
    %c0_59 = arith.constant 0 : index
    %162 = vector.load %arg7[%c0_58, %c0_59] : memref<256x256xbf16, #tpu.memory_space<vmem>>, vector<256x256xbf16>
    %cst_60 = arith.constant dense<0.000000e+00> : vector<16x256xf32>
    %163 = tpu.matmul %161, %162, %cst_60 {dimension_numbers = #tpu.dot_dimension_numbers<[1], [0], [0], [1], [0, 0, 1, 1], [], []>} : vector<16x256xbf16>, vector<256x256xbf16>, vector<16x256xf32> -> vector<16x256xf32>
    %c0_61 = arith.constant 0 : index
    %c0_62 = arith.constant 0 : index
    %164 = vector.load %arg8[%c0_61, %c0_62] : memref<1x256xf32, #tpu.memory_space<vmem>>, vector<1x256xf32>
    %165 = vector.broadcast %164 : vector<1x256xf32> to vector<16x256xf32>
    %166 = arith.addf %163, %165 : vector<16x256xf32>
    %c0_63 = arith.constant 0 : index
    %c0_64 = arith.constant 0 : index
    %c0_65 = arith.constant 0 : index
    %167 = vector.load %arg9[%c0_63, %c0_64, %c0_65] : memref<1x16x256xf32, #tpu.memory_space<vmem>>, vector<1x16x256xf32>
    %168 = vector.shape_cast %167 : vector<1x16x256xf32> to vector<16x256xf32>
    %169 = vector.shape_cast %166 : vector<16x256xf32> to vector<1x16x256xf32>
    tpu.vector_store %arg9[%c0_63, %c0_64, %c0_65], %169 {strides = array<i32>} : memref<1x16x256xf32, #tpu.memory_space<vmem>>, vector<1x16x256xf32>,
    return
  }
  func.func @transform_0(%arg0: i32, %arg1: i32) -> (i32, i32, i32) {
    %c0_i32 = arith.constant 0 : i32
    %c0_i32_0 = arith.constant 0 : i32
    return %arg0, %arg1, %c0_i32 : i32, i32, i32
  }
  func.func @transform_1(%arg0: i32, %arg1: i32) -> (i32, i32, i32) {
    %c0_i32 = arith.constant 0 : i32
    %c0_i32_0 = arith.constant 0 : i32
    %c0_i32_1 = arith.constant 0 : i32
    return %arg0, %c0_i32, %c0_i32_0 : i32, i32, i32
  }
  func.func @transform_2(%arg0: i32, %arg1: i32) -> (i32, i32, i32) {
    %c0_i32 = arith.constant 0 : i32
    %c0_i32_0 = arith.constant 0 : i32
    %c0_i32_1 = arith.constant 0 : i32
    return %arg0, %c0_i32, %c0_i32_0 : i32, i32, i32
  }
  func.func @transform_3(%arg0: i32, %arg1: i32) -> (i32, i32, i32) {
    %c0_i32 = arith.constant 0 : i32
    %c0_i32_0 = arith.constant 0 : i32
    return %arg0, %arg1, %c0_i32 : i32, i32, i32
  }
  func.func @transform_4(%arg0: i32, %arg1: i32) -> (i32, i32) {
    %c0_i32 = arith.constant 0 : i32
    %c0_i32_0 = arith.constant 0 : i32
    %c0_i32_1 = arith.constant 0 : i32
    return %c0_i32, %c0_i32_0 : i32, i32
  }
  func.func @transform_5(%arg0: i32, %arg1: i32) -> (i32, i32) {
    %c0_i32 = arith.constant 0 : i32
    %c0_i32_0 = arith.constant 0 : i32
    %c0_i32_1 = arith.constant 0 : i32
    return %c0_i32, %c0_i32_0 : i32, i32
  }
  func.func @transform_6(%arg0: i32, %arg1: i32) -> (i32, i32) {
    %c0_i32 = arith.constant 0 : i32
    %c0_i32_0 = arith.constant 0 : i32
    %c0_i32_1 = arith.constant 0 : i32
    return %c0_i32, %c0_i32_0 : i32, i32
  }
  func.func @transform_7(%arg0: i32, %arg1: i32) -> (i32, i32, i32) {
    %c0_i32 = arith.constant 0 : i32
    %c0_i32_0 = arith.constant 0 : i32
    return %arg0, %arg1, %c0_i32 : i32, i32, i32
  }
}

</mosaic_0001>

<bundles_post_ra>
// kernel: grouped_query_attention_forward.2
= control target key start
LH: loop header
LB: loop body
LE: loop exit
PB: predicated region body
PF: predicated region fallthrough
CT: control target
= control target key end

     0   :  { %s973_s2 = inlined_call_operand.vmem [shape: bf16[256,256], index: 2, kind: input, shape index: {}]   ;;  %s974_s3 = inlined_call_operand.vmem [shape: bf16[256,256], index: 3, kind: input, shape index: {}]   ;;  %s975_s0 = inlined_call_operand.vmem [shape: bf16[1,16,256], index: 0, kind: input, shape index: {}]   ;;  %s976_s1 = inlined_call_operand.vmem [shape: bf16[1,16,256], index: 1, kind: input, shape index: {}]   ;;  %s977_s4 = inlined_call_operand.vmem [shape: bf16[1,16,256], index: 4, kind: output, shape index: {0}]   ;;  %s978_s5 = inlined_call_operand.vmem [shape: bf16[1,16,256], index: 5, kind: output, shape index: {1}]  }
   0x1   :  { %v625_v0 = vld [vmem:[%s973_s2 + $0x74] ss:$8 sps:$4 sm:$0xff]   ;;  %v629_v2 = vld [vmem:[%s973_s2 + $0x70] ss:$8 sps:$4 sm:$0xff]   ;;  %v631_v4 = vld [vmem:[%s973_s2 + $0x64] ss:$8 sps:$4 sm:$0xff]  }
   0x2   :  { %v627_v1 = vld [vmem:[%s974_s3 + $0x74] ss:$8 sps:$4 sm:$0xff]   ;;  %223 = vmatprep.subr.bf16.mxu0 %v625_v0  ;;  %v630_v3 = vld [vmem:[%s974_s3 + $0x70] ss:$8 sps:$4 sm:$0xff]   ;;  %v633_v5 = vld [vmem:[%s974_s3 + $0x64] ss:$8 sps:$4 sm:$0xff]  }
   0x3   :  { %484 = vmatprep.subr.bf16.mxu1 %v627_v1  ;;  %224 = vmatpush1.bf16.msra.mxu0 %v629_v2  ;;  %v635_v6 = vld [vmem:[%s973_s2 + $0x60] ss:$8 sps:$4 sm:$0xff]   ;;  %v637_v8 = vld [vmem:[%s973_s2 + $0x54] ss:$8 sps:$4 sm:$0xff]   ;;  %v641_v10 = vld [vmem:[%s973_s2 + $0x50] ss:$8 sps:$4 sm:$0xff]  }
   0x4   :  { %485 = vmatpush1.bf16.msra.mxu1 %v630_v3  ;;  %225 = vmatprep.subr.bf16.mxu0 %v631_v4  ;;  %v636_v7 = vld [vmem:[%s974_s3 + $0x60] ss:$8 sps:$4 sm:$0xff]   ;;  %v639_v9 = vld [vmem:[%s974_s3 + $0x54] ss:$8 sps:$4 sm:$0xff]   ;;  %v642_v11 = vld [vmem:[%s974_s3 + $0x50] ss:$8 sps:$4 sm:$0xff]  }
   0x5   :  { %486 = vmatprep.subr.bf16.mxu1 %v633_v5  ;;  %v643_v12 = vld [vmem:[%s973_s2 + $0x44] ss:$8 sps:$4 sm:$0xff]   ;;  %v647_v14 = vld [vmem:[%s973_s2 + $0x40] ss:$8 sps:$4 sm:$0xff]   ;;  %v649_v16 = vld [vmem:[%s973_s2 + $0x34] ss:$8 sps:$4 sm:$0xff]  }
   0x6   :  { %v645_v13 = vld [vmem:[%s974_s3 + $0x44] ss:$8 sps:$4 sm:$0xff]   ;;  %v648_v15 = vld [vmem:[%s974_s3 + $0x40] ss:$8 sps:$4 sm:$0xff]   ;;  %v651_v17 = vld [vmem:[%s974_s3 + $0x34] ss:$8 sps:$4 sm:$0xff]  }
   0x7   :  { %226 = vmatpush1.bf16.msra.mxu0 %v635_v6  ;;  %v653_v18 = vld [vmem:[%s973_s2 + $0x30] ss:$8 sps:$4 sm:$0xff]   ;;  %v655_v20 = vld [vmem:[%s973_s2 + $0x24] ss:$8 sps:$4 sm:$0xff]   ;;  %v659_v22 = vld [vmem:[%s973_s2 + $0x20] ss:$8 sps:$4 sm:$0xff]  }
   0x8   :  { %487 = vmatpush1.bf16.msra.mxu1 %v636_v7  ;;  %227 = vmatprep.subr.bf16.mxu0 %v637_v8  ;;  %v654_v19 = vld [vmem:[%s974_s3 + $0x30] ss:$8 sps:$4 sm:$0xff]   ;;  %v657_v21 = vld [vmem:[%s974_s3 + $0x24] ss:$8 sps:$4 sm:$0xff]   ;;  %v660_v23 = vld [vmem:[%s974_s3 + $0x20] ss:$8 sps:$4 sm:$0xff]  }
   0x9   :  { %488 = vmatprep.subr.bf16.mxu1 %v639_v9  ;;  %v661_v24 = vld [vmem:[%s973_s2 + $0x14] ss:$8 sps:$4 sm:$0xff]   ;;  %v665_v26 = vld [vmem:[%s973_s2 + $0x10] ss:$8 sps:$4 sm:$0xff]   ;;  %v667_v28 = vld [vmem:[%s973_s2 + $0x4] ss:$8 sps:$4 sm:$0xff]  }
   0xa   :  { %v663_v25 = vld [vmem:[%s974_s3 + $0x14] ss:$8 sps:$4 sm:$0xff]   ;;  %v666_v27 = vld [vmem:[%s974_s3 + $0x10] ss:$8 sps:$4 sm:$0xff]   ;;  %v669_v29 = vld [vmem:[%s974_s3 + $0x4] ss:$8 sps:$4 sm:$0xff]  }
   0xb   :  { %228 = vmatpush1.bf16.msra.mxu0 %v641_v10  ;;  %v671_v30 = vld [vmem:[%s973_s2] ss:$8 sps:$4 sm:$0xff]   ;;  %v673_v32 = vld [vmem:[%s973_s2 + $0xf4] ss:$8 sps:$4 sm:$0xff]   ;;  %v677_v34 = vld [vmem:[%s973_s2 + $0xf0] ss:$8 sps:$4 sm:$0xff]  }
   0xc   :  { %489 = vmatpush1.bf16.msra.mxu1 %v642_v11  ;;  %229 = vmatprep.subr.bf16.mxu0 %v643_v12  ;;  %v672_v31 = vld [vmem:[%s974_s3] ss:$8 sps:$4 sm:$0xff]   ;;  %v675_v33 = vld [vmem:[%s974_s3 + $0xf4] ss:$8 sps:$4 sm:$0xff]   ;;  %v678_v35 = vld [vmem:[%s974_s3 + $0xf0] ss:$8 sps:$4 sm:$0xff]  }
   0xd   :  { %490 = vmatprep.subr.bf16.mxu1 %v645_v13  ;;  %v679_v36 = vld [vmem:[%s973_s2 + $0xe4] ss:$8 sps:$4 sm:$0xff]   ;;  %v683_v38 = vld [vmem:[%s973_s2 + $0xe0] ss:$8 sps:$4 sm:$0xff]   ;;  %v685_v40 = vld [vmem:[%s973_s2 + $0xd4] ss:$8 sps:$4 sm:$0xff]  }
   0xe   :  { %v681_v37 = vld [vmem:[%s974_s3 + $0xe4] ss:$8 sps:$4 sm:$0xff]   ;;  %v684_v39 = vld [vmem:[%s974_s3 + $0xe0] ss:$8 sps:$4 sm:$0xff]   ;;  %v687_v41 = vld [vmem:[%s974_s3 + $0xd4] ss:$8 sps:$4 sm:$0xff]  }
   0xf   :  { %230 = vmatpush1.bf16.msra.mxu0 %v647_v14  ;;  %v689_v42 = vld [vmem:[%s973_s2 + $0xd0] ss:$8 sps:$4 sm:$0xff]   ;;  %v691_v44 = vld [vmem:[%s973_s2 + $0xc4] ss:$8 sps:$4 sm:$0xff]   ;;  %v695_v46 = vld [vmem:[%s973_s2 + $0xc0] ss:$8 sps:$4 sm:$0xff]  }
  0x10   :  { %491 = vmatpush1.bf16.msra.mxu1 %v648_v15  ;;  %231 = vmatprep.subr.bf16.mxu0 %v649_v16  ;;  %v690_v43 = vld [vmem:[%s974_s3 + $0xd0] ss:$8 sps:$4 sm:$0xff]   ;;  %v693_v45 = vld [vmem:[%s974_s3 + $0xc4] ss:$8 sps:$4 sm:$0xff]   ;;  %v696_v48 = vld [vmem:[%s974_s3 + $0xc0] ss:$8 sps:$4 sm:$0xff]  }
  0x11   :  { %492 = vmatprep.subr.bf16.mxu1 %v651_v17  ;;  %v723_v47 = vld [vmem:[%s975_s0 + $0x4] ss:$8 sps:$4 sm:$0xff]   ;;  %v697_v49 = vld [vmem:[%s973_s2 + $0xb4] ss:$8 sps:$4 sm:$0xff]   ;;  %v701_v52 = vld [vmem:[%s973_s2 + $0xb0] ss:$8 sps:$4 sm:$0xff]  }
  0x12   :  { %v699_v50 = vld [vmem:[%s974_s3 + $0xb4] ss:$8 sps:$4 sm:$0xff]   ;;  %v726_v51 = vld [vmem:[%s976_s1 + $0x4] ss:$8 sps:$4 sm:$0xff]   ;;  %255 = vmatprep.mubr.bf16.mxu0 %v723_v47  ;;  %v702_v53 = vld [vmem:[%s974_s3 + $0xb0] ss:$8 sps:$4 sm:$0xff]  }
  0x13   :  { %232 = vmatpush1.bf16.msra.mxu0 %v653_v18  ;;  %516 = vmatprep.mubr.bf16.mxu1 %v726_v51  ;;  %v703_v54 = vld [vmem:[%s973_s2 + $0xa4] ss:$8 sps:$4 sm:$0xff]   ;;  %v707_v56 = vld [vmem:[%s973_s2 + $0xa0] ss:$8 sps:$4 sm:$0xff]   ;;  %v709_v58 = vld [vmem:[%s973_s2 + $0x94] ss:$8 sps:$4 sm:$0xff]  }
  0x14   :  { %493 = vmatpush1.bf16.msra.mxu1 %v654_v19  ;;  %233 = vmatprep.subr.bf16.mxu0 %v655_v20  ;;  %v705_v55 = vld [vmem:[%s974_s3 + $0xa4] ss:$8 sps:$4 sm:$0xff]   ;;  %v708_v57 = vld [vmem:[%s974_s3 + $0xa0] ss:$8 sps:$4 sm:$0xff]   ;;  %v711_v59 = vld [vmem:[%s974_s3 + $0x94] ss:$8 sps:$4 sm:$0xff]  }
  0x15   :  { %494 = vmatprep.subr.bf16.mxu1 %v657_v21  ;;  %v713_v60 = vld [vmem:[%s973_s2 + $0x90] ss:$8 sps:$4 sm:$0xff]   ;;  %v715_v62 = vld [vmem:[%s973_s2 + $0x84] ss:$8 sps:$4 sm:$0xff]   ;;  %v719_v0 = vld [vmem:[%s973_s2 + $0x80] ss:$8 sps:$4 sm:$0xff]  }
  0x16   :  { %v714_v61 = vld [vmem:[%s974_s3 + $0x90] ss:$8 sps:$4 sm:$0xff]   ;;  %v717_v63 = vld [vmem:[%s974_s3 + $0x84] ss:$8 sps:$4 sm:$0xff]   ;;  %v720_v1 = vld [vmem:[%s974_s3 + $0x80] ss:$8 sps:$4 sm:$0xff]  }
  0x17   :  { %234 = vmatpush1.bf16.msra.mxu0 %v659_v22  ;;  %v721_v2 = vld [vmem:[%s975_s0] ss:$8 sps:$4 sm:$0xff]  }
  0x18   :  { %495 = vmatpush1.bf16.msra.mxu1 %v660_v23  ;;  %235 = vmatprep.subr.bf16.mxu0 %v661_v24  ;;  %v724_v3 = vld [vmem:[%s976_s1] ss:$8 sps:$4 sm:$0xff]  }
  0x19   :  { %496 = vmatprep.subr.bf16.mxu1 %v663_v25 }
  0x1b   :  { %236 = vmatpush1.bf16.msra.mxu0 %v665_v26 }
  0x1c   :  { %497 = vmatpush1.bf16.msra.mxu1 %v666_v27  ;;  %237 = vmatprep.subr.bf16.mxu0 %v667_v28 }
  0x1d   :  { %498 = vmatprep.subr.bf16.mxu1 %v669_v29 }
  0x1f   :  { %238 = vmatpush1.bf16.msra.mxu0 %v671_v30 }
  0x20   :  { %499 = vmatpush1.bf16.msra.mxu1 %v672_v31  ;;  %239 = vmatprep.subr.bf16.mxu0 %v673_v32 }
  0x21   :  { %500 = vmatprep.subr.bf16.mxu1 %v675_v33 }
  0x23   :  { %240 = vmatpush2.bf16.msra.mxu0 %v677_v34 }
  0x24   :  { %501 = vmatpush2.bf16.msra.mxu1 %v678_v35  ;;  %241 = vmatprep.subr.bf16.mxu0 %v679_v36 }
  0x25   :  { %502 = vmatprep.subr.bf16.mxu1 %v681_v37 }
  0x27   :  { %242 = vmatpush2.bf16.msra.mxu0 %v683_v38 }
  0x28   :  { %503 = vmatpush2.bf16.msra.mxu1 %v684_v39  ;;  %243 = vmatprep.subr.bf16.mxu0 %v685_v40 }
  0x29   :  { %504 = vmatprep.subr.bf16.mxu1 %v687_v41 }
  0x2b   :  { %244 = vmatpush2.bf16.msra.mxu0 %v689_v42 }
  0x2c   :  { %505 = vmatpush2.bf16.msra.mxu1 %v690_v43  ;;  %245 = vmatprep.subr.bf16.mxu0 %v691_v44 }
  0x2d   :  { %506 = vmatprep.subr.bf16.mxu1 %v693_v45 }
  0x2f   :  { %246 = vmatpush2.bf16.msra.mxu0 %v695_v46 }
  0x30   :  { %507 = vmatpush2.bf16.msra.mxu1 %v696_v48  ;;  %247 = vmatprep.subr.bf16.mxu0 %v697_v49 }
  0x31   :  { %508 = vmatprep.subr.bf16.mxu1 %v699_v50 }
  0x33   :  { %248 = vmatpush2.bf16.msra.mxu0 %v701_v52 }
  0x34   :  { %509 = vmatpush2.bf16.msra.mxu1 %v702_v53  ;;  %249 = vmatprep.subr.bf16.mxu0 %v703_v54 }
  0x35   :  { %510 = vmatprep.subr.bf16.mxu1 %v705_v55 }
  0x37   :  { %250 = vmatpush2.bf16.msra.mxu0 %v707_v56 }
  0x38   :  { %511 = vmatpush2.bf16.msra.mxu1 %v708_v57  ;;  %251 = vmatprep.subr.bf16.mxu0 %v709_v58 }
  0x39   :  { %512 = vmatprep.subr.bf16.mxu1 %v711_v59 }
  0x3b   :  { %252 = vmatpush2.bf16.msra.mxu0 %v713_v60 }
  0x3c   :  { %513 = vmatpush2.bf16.msra.mxu1 %v714_v61  ;;  %253 = vmatprep.subr.bf16.mxu0 %v715_v62 }
  0x3d   :  { %514 = vmatprep.subr.bf16.mxu1 %v717_v63 }
  0x3f   :  { %254 = vmatpush2.bf16.msra.mxu0 %v719_v0 }
  0x40   :  { %515 = vmatpush2.bf16.msra.mxu1 %v720_v1 }
  0x42   :  { %256 = vmatmul.mubr.bf16.vlgmr.msra.gmra.mxu0 %v721_v2 }
  0x43   :  { %517 = vmatmul.mubr.bf16.vlgmr.msra.gmra.mxu1 %v724_v3 }
 0x102   :  { %v257_v4 = vpop.f32.mrf.mxu0 }
 0x103   :  { %v518_v5 = vpop.f32.mrf.mxu1 }
 0x104   :  { %v259_v6 = vpop.f32.mrf.mxu0 }
 0x105   :  { %v520_v7 = vpop.f32.mrf.mxu1  ;;  %v621_v8 = vpack.c.bf16 %v259_v6, %v257_v4 }
 0x106   :  { %v623_v9 = vpack.c.bf16 %v520_v7, %v518_v5  ;;  %v261_v10 = vpop.f32.mrf.mxu0 }
 0x107   :  { %v522_v11 = vpop.f32.mrf.mxu1  ;;  %278 = vst [vmem:[%s977_s4] sm:$0xff] %v621_v8 }
 0x108   :  { %539 = vst [vmem:[%s978_s5] sm:$0xff] %v623_v9  ;;  %v263_v12 = vpop.f32.mrf.mxu0 }
 0x109   :  { %v524_v13 = vpop.f32.mrf.mxu1  ;;  %v622_v14 = vpack.c.bf16 %v263_v12, %v261_v10 }
 0x10a   :  { %v624_v15 = vpack.c.bf16 %v524_v13, %v522_v11 }
 0x10b   :  { %279 = vst [vmem:[%s977_s4 + $0x8] sm:$0xff] %v622_v14 }
 0x10c   :  { %540 = vst [vmem:[%s978_s5 + $0x8] sm:$0xff] %v624_v15 }

// kernel: grouped_query_attention_forward.3
= control target key start
LH: loop header
LB: loop body
LE: loop exit
PB: predicated region body
PF: predicated region fallthrough
CT: control target
= control target key end

     0   :  { %v1988_v1 = vmov 0.0   ;;  %vm295_vm0 = vcmask 261120   ;;  %vm1990_vm1 = vmmov 0   ;;  %vm343_vm2 = vcmask 130048   ;;  %s1991_s27 = smov 64   ;;  %s1992_s28 = smov 32   ;;  %s2552_s4 = inlined_call_operand.vmem [shape: bf16[256,256], index: 4, kind: input, shape index: {}]   ;;  %s2553_s0 = inlined_call_operand.vmem [shape: bf16[1,16,256], index: 0, kind: input, shape index: {}]   ;;  %s2554_s1 = inlined_call_operand.vmem [shape: bf16[1,16,256], index: 1, kind: input, shape index: {}]   ;;  %s2555_s3 = inlined_call_operand.vmem [shape: s8[1,16,16], index: 3, kind: input, shape index: {}]   ;;  %s2556_s2 = inlined_call_operand.vmem [shape: bf16[1,16,256], index: 2, kind: input, shape index: {}]   ;;  %s2557_s5 = inlined_call_operand.vmem [shape: bf16[256,256], index: 5, kind: input, shape index: {}]   ;;  %s2558_s6 = inlined_call_operand.vmem [shape: f32[1,256], index: 6, kind: input, shape index: {}]   ;;  %s2559_s7 = inlined_call_operand.vmem [shape: f32[1,16,256], index: 7, kind: output, shape index: {}]  }
   0x1   :  { %v1819_v0 = vld [vmem:[%s2552_s4 + $0x74] ss:$8 sps:$4 sm:$0xff]   ;;  %1718 = vmatprep.subr.bf16.mxu1 %v1988_v1  ;;  %v1821_v2 = vld [vmem:[%s2552_s4 + $0x70] ss:$8 sps:$4 sm:$0xff]   ;;  %v1822_v3 = vld [vmem:[%s2552_s4 + $0x64] ss:$8 sps:$4 sm:$0xff]   ;;  %1720 = vmatprep.mubr.msk.bf16.mxu1 %vm1990_vm1, %v1988_v1 }
   0x2   :  { %235 = vmatprep.subr.bf16.mxu0 %v1819_v0  ;;  %v1824_v4 = vld [vmem:[%s2552_s4 + $0x60] ss:$8 sps:$4 sm:$0xff]   ;;  %v1825_v5 = vld [vmem:[%s2552_s4 + $0x54] ss:$8 sps:$4 sm:$0xff]   ;;  %v1827_v6 = vld [vmem:[%s2552_s4 + $0x50] ss:$8 sps:$4 sm:$0xff]  }
   0x3   :  { %236 = vmatpush1.bf16.msra.mxu0 %v1821_v2  ;;  %v1828_v7 = vld [vmem:[%s2552_s4 + $0x44] ss:$8 sps:$4 sm:$0xff]   ;;  %v1830_v8 = vld [vmem:[%s2552_s4 + $0x40] ss:$8 sps:$4 sm:$0xff]   ;;  %v1831_v9 = vld [vmem:[%s2552_s4 + $0x34] ss:$8 sps:$4 sm:$0xff]  }
   0x4   :  { %237 = vmatprep.subr.bf16.mxu0 %v1822_v3  ;;  %v1833_v10 = vld [vmem:[%s2552_s4 + $0x30] ss:$8 sps:$4 sm:$0xff]   ;;  %v1834_v11 = vld [vmem:[%s2552_s4 + $0x24] ss:$8 sps:$4 sm:$0xff]   ;;  %v1836_v12 = vld [vmem:[%s2552_s4 + $0x20] ss:$8 sps:$4 sm:$0xff]  }
   0x5   :  { %v1837_v13 = vld [vmem:[%s2552_s4 + $0x14] ss:$8 sps:$4 sm:$0xff]   ;;  %v1869_v14 = vld [vmem:[%s2553_s0 + $0x4] ss:$8 sps:$4 sm:$0xff]   ;;  %v1839_v15 = vld [vmem:[%s2552_s4 + $0x10] ss:$8 sps:$4 sm:$0xff]  }
   0x6   :  { %v1840_v16 = vld [vmem:[%s2552_s4 + $0x4] ss:$8 sps:$4 sm:$0xff]   ;;  %267 = vmatprep.mubr.bf16.mxu0 %v1869_v14  ;;  %v1842_v17 = vld [vmem:[%s2552_s4] ss:$8 sps:$4 sm:$0xff]   ;;  %v1843_v18 = vld [vmem:[%s2552_s4 + $0xf4] ss:$8 sps:$4 sm:$0xff]  }
   0x7   :  { %238 = vmatpush1.bf16.msra.mxu0 %v1824_v4  ;;  %v1845_v19 = vld [vmem:[%s2552_s4 + $0xf0] ss:$8 sps:$4 sm:$0xff]   ;;  %v1846_v20 = vld [vmem:[%s2552_s4 + $0xe4] ss:$8 sps:$4 sm:$0xff]   ;;  %v1848_v21 = vld [vmem:[%s2552_s4 + $0xe0] ss:$8 sps:$4 sm:$0xff]  }
   0x8   :  { %239 = vmatprep.subr.bf16.mxu0 %v1825_v5  ;;  %v1849_v22 = vld [vmem:[%s2552_s4 + $0xd4] ss:$8 sps:$4 sm:$0xff]   ;;  %v1851_v23 = vld [vmem:[%s2552_s4 + $0xd0] ss:$8 sps:$4 sm:$0xff]   ;;  %v1852_v24 = vld [vmem:[%s2552_s4 + $0xc4] ss:$8 sps:$4 sm:$0xff]  }
   0x9   :  { %v1854_v25 = vld [vmem:[%s2552_s4 + $0xc0] ss:$8 sps:$4 sm:$0xff]   ;;  %v1855_v26 = vld [vmem:[%s2552_s4 + $0xb4] ss:$8 sps:$4 sm:$0xff]   ;;  %v1857_v27 = vld [vmem:[%s2552_s4 + $0xb0] ss:$8 sps:$4 sm:$0xff]  }
   0xa   :  { %v1858_v28 = vld [vmem:[%s2552_s4 + $0xa4] ss:$8 sps:$4 sm:$0xff]   ;;  %v1860_v29 = vld [vmem:[%s2552_s4 + $0xa0] ss:$8 sps:$4 sm:$0xff]   ;;  %v1861_v30 = vld [vmem:[%s2552_s4 + $0x94] ss:$8 sps:$4 sm:$0xff]  }
   0xb   :  { %240 = vmatpush1.bf16.msra.mxu0 %v1827_v6  ;;  %v1863_v31 = vld [vmem:[%s2552_s4 + $0x90] ss:$8 sps:$4 sm:$0xff]   ;;  %v1864_v32 = vld [vmem:[%s2552_s4 + $0x84] ss:$8 sps:$4 sm:$0xff]   ;;  %v1866_v33 = vld [vmem:[%s2552_s4 + $0x80] ss:$8 sps:$4 sm:$0xff]  }
   0xc   :  { %241 = vmatprep.subr.bf16.mxu0 %v1828_v7  ;;  %v1867_v34 = vld [vmem:[%s2553_s0] ss:$8 sps:$4 sm:$0xff]   ;;  %s1989_s4 = smov 96   ;;  %vm549_vm3 = vcmask 523520   ;;  %vm681_vm4 = vcmask 785920   ;;  %vm813_vm5 = vcmask 1048320  }
   0xd   :  { %v2139_v35 = vld [vmem:[%s2554_s1] ss:$8 sps:$4 sm:$0xff]  }
   0xe   :  { %v300_v36 = vsel %vm295_vm0, %v2139_v35, 0  ;;  %422 = vrot.lane.b32.xlu1 %v2139_v35, %s1989_s4  ;;  %v1683_v41 = vld [vmem:[%s2555_s3] sm:$0xf]  }
   0xf   :  { %242 = vmatpush1.bf16.msra.mxu0 %v1830_v8  ;;  %1719 = vmatpush3.bf16.xpose.msra.mxu1 %v300_v36  ;;  %v1684_v42 = vunpack.c.0.s8 %v1683_v41  ;;  %v1685_v44 = vunpack.c.1.s8 %v1683_v41  ;;  %v2172_v58 = vld [vmem:[%s2556_s2] ss:$8 sps:$4 sm:$0xff]  }
  0x10   :  { %243 = vmatprep.subr.bf16.mxu0 %v1831_v9  ;;  %1724 = vmatprep.subr.bf16.mxu1 %v1988_v1 }
  0x11   :  { %v284_v43 = vcvt.s32.f32 %v1684_v42  ;;  %v285_v46 = vcvt.s32.f32 %v1685_v44 }
  0x13   :  { %244 = vmatpush1.bf16.msra.mxu0 %v1833_v10  ;;  %v1628_v45 = vadd.f32 -1.0, %v284_v43  ;;  %v1629_v48 = vadd.f32 -1.0, %v285_v46 }
  0x14   :  { %245 = vmatprep.subr.bf16.mxu0 %v1834_v11 }
  0x15   :  { %v2161_v47 = vmul.f32 1e+20, %v1628_v45  ;;  %v2164_v51 = vmul.f32 1e+20, %v1629_v48 }
  0x17   :  { %246 = vmatpush1.bf16.msra.mxu0 %v1836_v12 }
  0x18   :  { %247 = vmatprep.subr.bf16.mxu0 %v1837_v13 }
  0x1b   :  { %248 = vmatpush1.bf16.msra.mxu0 %v1839_v15 }
  0x1c   :  { %249 = vmatprep.subr.bf16.mxu0 %v1840_v16 }
  0x1f   :  { %250 = vmatpush1.bf16.msra.mxu0 %v1842_v17 }
  0x20   :  { %251 = vmatprep.subr.bf16.mxu0 %v1843_v18 }
  0x23   :  { %252 = vmatpush2.bf16.msra.mxu0 %v1845_v19 }
  0x24   :  { %253 = vmatprep.subr.bf16.mxu0 %v1846_v20 }
  0x27   :  { %254 = vmatpush2.bf16.msra.mxu0 %v1848_v21 }
  0x28   :  { %255 = vmatprep.subr.bf16.mxu0 %v1849_v22 }
  0x2b   :  { %256 = vmatpush2.bf16.msra.mxu0 %v1851_v23 }
  0x2c   :  { %257 = vmatprep.subr.bf16.mxu0 %v1852_v24 }
  0x2f   :  { %258 = vmatpush2.bf16.msra.mxu0 %v1854_v25 }
  0x30   :  { %259 = vmatprep.subr.bf16.mxu0 %v1855_v26 }
  0x33   :  { %260 = vmatpush2.bf16.msra.mxu0 %v1857_v27 }
  0x34   :  { %261 = vmatprep.subr.bf16.mxu0 %v1858_v28 }
  0x37   :  { %262 = vmatpush2.bf16.msra.mxu0 %v1860_v29 }
  0x38   :  { %263 = vmatprep.subr.bf16.mxu0 %v1861_v30 }
  0x3b   :  { %264 = vmatpush2.bf16.msra.mxu0 %v1863_v31 }
  0x3c   :  { %265 = vmatprep.subr.bf16.mxu0 %v1864_v32 }
  0x3f   :  { %266 = vmatpush2.bf16.msra.mxu0 %v1866_v33 }
  0x42   :  { %268 = vmatmul.mubr.bf16.vlgmr.msra.gmra.mxu0 %v1867_v34 }
  0x80   :  { %v423_v4 = vpop.permute.xlu1 %422 }
  0x81   :  { %v428_v5 = vsel %vm295_vm0, %v423_v4, 0 }
 0x102   :  { %v269_v37 = vpop.f32.mrf.mxu0 }
 0x104   :  { %v2148_v38 = vpop.f32.mrf.mxu0 }
 0x106   :  { %v273_v39 = vpop.f32.mrf.mxu0 }
 0x107   :  { %v2150_v40 = vpack.c.bf16 %v273_v39, %v269_v37 }
 0x109   :  { %420 = vrot.lane.b32.xlu1 %v2150_v40, %s1989_s4  ;;  %1721 = vmatmul.mubr.msk.bf16.vlgmr.msra.gmra.mxu1 %vm295_vm0, %v2150_v40 }
 0x10a   :  { %1726 = vmatprep.mubr.msk.bf16.mxu1 %vm1990_vm1, %v1988_v1  ;;  %1725 = vmatpush3.bf16.msra.mxu1 %v2172_v58 }
 0x10b   :  { %1730 = vmatprep.subr.bf16.mxu1 %v1988_v1 }
 0x17b   :  { %v421_v7 = vpop.permute.xlu1 %420 }
 0x1c9   :  { %v336_v49 = vpop.f32.mrf.mxu1 }
 0x1ca   :  { %v337_v50 = vadd.f32 %v336_v49, %v2161_v47 }
 0x1cb   :  { %v1722_v52 = vpop.f32.mrf.mxu1 }
 0x1cc   :  { %v344_v53 = vsel %vm343_vm2, %v337_v50, -inf }
 0x1cd   :  { %345 = vmax.xlane.f32.xlu0 %v344_v53  ;;  %v339_v54 = vpop.f32.mrf.mxu1 }
 0x1ce   :  { %v340_v55 = vadd.f32 %v339_v54, %v2164_v51 }
 0x1cf   :  { %v1723_v56 = vpop.f32.mrf.mxu1 }
 0x1d0   :  { %v347_v57 = vsel %vm343_vm2, %v340_v55, -inf }
 0x1d1   :  { %348 = vmax.xlane.f32.xlu0 %v347_v57 }
 0x256   :  { %v346_v59 = vpop.xlane.xlu0 %345 }
 0x257   :  { %v350_v60 = vsub.f32 %v337_v50, %v346_v59 }
 0x259   :  { %v352_v61 = vmul.f32 1.442695, %v350_v60 }
 0x25a   :  { %v349_v62 = vpop.xlane.xlu0 %348 }
 0x25b   :  { %v351_v63 = vsub.f32 %v340_v55, %v349_v62  ;;  %1924 = vpow2.f32 %v352_v61 }
 0x25d   :  { %v354_v0 = vmul.f32 1.442695, %v351_v63 }
 0x25f   :  { %1926 = vpow2.f32 %v354_v0 }
 0x268   :  { %v2176_v2 = vpop.eup %1924 }
 0x26c   :  { %v2178_v3 = vpop.eup %1926 }
 0x26d   :  { %v362_v6 = vpack.c.bf16 %v2178_v3, %v2176_v2 }
 0x26f   :  { %1727 = vmatmul.mubr.msk.bf16.vlgmr.msra.gmra.mxu1 %vm343_vm2, %v362_v6 }
 0x270   :  { %1731 = vmatpush3.bf16.xpose.msra.mxu1 %v428_v5  ;;  %1732 = vmatprep.mubr.msk.bf16.mxu1 %vm1990_vm1, %v1988_v1 }
 0x271   :  { %1736 = vmatprep.subr.bf16.mxu1 %v1988_v1 }
 0x277   :  { %1733 = vmatmul.mubr.msk.bf16.vlgmr.msra.gmra.mxu1 %vm295_vm0, %v421_v7 }
 0x278   :  { %1738 = vmatprep.mubr.msk.bf16.mxu1 %vm1990_vm1, %v1988_v1 }
 0x32f   :  { %v2190_v8 = vpop.f32.mrf.mxu1 }
 0x331   :  { %v1728_v9 = vpop.f32.mrf.mxu1 }
 0x333   :  { %v2192_v10 = vpop.f32.mrf.mxu1 }
 0x335   :  { %v1729_v11 = vpop.f32.mrf.mxu1 }
 0x337   :  { %v464_v12 = vpop.f32.mrf.mxu1 }
 0x338   :  { %v465_v13 = vadd.f32 %v464_v12, %v2161_v47 }
 0x339   :  { %v1734_v14 = vpop.f32.mrf.mxu1 }
 0x33a   :  { %v471_v15 = vsel %vm343_vm2, %v465_v13, -inf }
 0x33b   :  { %472 = vmax.xlane.f32.xlu0 %v471_v15  ;;  %v467_v16 = vpop.f32.mrf.mxu1 }
 0x33c   :  { %v468_v17 = vadd.f32 %v467_v16, %v2164_v51 }
 0x33d   :  { %v1735_v18 = vpop.f32.mrf.mxu1 }
 0x33e   :  { %v474_v19 = vsel %vm343_vm2, %v468_v17, -inf }
 0x33f   :  { %475 = vmax.xlane.f32.xlu1 %v474_v19 }
 0x350   :  { %622 = vrot.lane.b32.xlu1 %v2172_v58, %s1991_s27 }
 0x351   :  { %490 = vrot.lane.b32.xlu0 %v2172_v58, %s1989_s4 }
 0x355   :  { %554 = vrot.lane.b32.xlu0 %v2139_v35, %s1991_s27 }
 0x359   :  { %552 = vrot.lane.b32.xlu0 %v2150_v40, %s1991_s27 }
 0x3c4   :  { %v473_v20 = vpop.xlane.xlu0 %472 }
 0x3c5   :  { %v477_v21 = vsub.f32 %v465_v13, %v473_v20 }
 0x3c7   :  { %v479_v22 = vmul.f32 1.442695, %v477_v21 }
 0x3c8   :  { %v491_v23 = vpop.permute.xlu0 %490  ;;  %v476_v24 = vpop.xlane.xlu1 %475 }
 0x3c9   :  { %v478_v25 = vsub.f32 %v468_v17, %v476_v24  ;;  %1737 = vmatpush3.bf16.msra.mxu1 %v491_v23  ;;  %1928 = vpow2.f32 %v479_v22  ;;  %v2262_v22 = vld [vmem:[%s2554_s1 + $0x4] ss:$8 sps:$4 sm:$0xff]  }
 0x3ca   :  { %1742 = vmatprep.subr.bf16.mxu1 %v1988_v1 }
 0x3cb   :  { %v481_v26 = vmul.f32 1.442695, %v478_v25  ;;  %v823_v25 = vsel %vm295_vm0, %v2262_v22, 0 }
 0x3cc   :  { %v555_v29 = vpop.permute.xlu0 %554  ;;  %v623_v33 = vpop.permute.xlu1 %622 }
 0x3cd   :  { %1930 = vpow2.f32 %v481_v26  ;;  %v560_v30 = vsel %vm295_vm0, %v555_v29, 0  ;;  %v275_v26 = vpop.f32.mrf.mxu0 }
 0x3ce   :  { %v2277_v29 = vpack.c.bf16 %v275_v26, %v2148_v38 }
 0x3d0   :  { %v553_v32 = vpop.permute.xlu0 %552 }
 0x3d6   :  { %v2207_v27 = vpop.eup %1928 }
 0x3da   :  { %v2209_v28 = vpop.eup %1930 }
 0x3db   :  { %v489_v31 = vpack.c.bf16 %v2209_v28, %v2207_v27 }
 0x3dd   :  { %1739 = vmatmul.mubr.msk.bf16.vlgmr.msra.gmra.mxu1 %vm343_vm2, %v489_v31 }
 0x3de   :  { %1743 = vmatpush3.bf16.xpose.msra.mxu1 %v560_v30  ;;  %1744 = vmatprep.mubr.msk.bf16.mxu1 %vm1990_vm1, %v1988_v1 }
 0x3df   :  { %1748 = vmatprep.subr.bf16.mxu1 %v1988_v1 }
 0x3e5   :  { %1745 = vmatmul.mubr.msk.bf16.vlgmr.msra.gmra.mxu1 %vm295_vm0, %v553_v32 }
 0x3e6   :  { %1750 = vmatprep.mubr.msk.bf16.mxu1 %vm1990_vm1, %v1988_v1  ;;  %1749 = vmatpush3.bf16.msra.mxu1 %v623_v33 }
 0x3e7   :  { %1754 = vmatprep.subr.bf16.mxu1 %v1988_v1 }
 0x49d   :  { %v2222_v34 = vpop.f32.mrf.mxu1 }
 0x49f   :  { %v1740_v36 = vpop.f32.mrf.mxu1 }
 0x4a1   :  { %v2224_v37 = vpop.f32.mrf.mxu1 }
 0x4a3   :  { %v1741_v39 = vpop.f32.mrf.mxu1 }
 0x4a5   :  { %v596_v41 = vpop.f32.mrf.mxu1 }
 0x4a6   :  { %v597_v42 = vadd.f32 %v596_v41, %v2161_v47 }
 0x4a7   :  { %v1746_v43 = vpop.f32.mrf.mxu1 }
 0x4a8   :  { %v603_v44 = vsel %vm343_vm2, %v597_v42, -inf }
 0x4a9   :  { %604 = vmax.xlane.f32.xlu0 %v603_v44  ;;  %v599_v45 = vpop.f32.mrf.mxu1 }
 0x4aa   :  { %v600_v46 = vadd.f32 %v599_v45, %v2164_v51 }
 0x4ab   :  { %v1747_v48 = vpop.f32.mrf.mxu1 }
 0x4ac   :  { %v606_v49 = vsel %vm343_vm2, %v600_v46, -inf }
 0x4ad   :  { %607 = vmax.xlane.f32.xlu1 %v606_v49 }
 0x4be   :  { %686 = vrot.lane.b32.xlu1 %v2139_v35, %s1992_s28 }
 0x4c2   :  { %684 = vrot.lane.b32.xlu1 %v2150_v40, %s1992_s28 }
 0x532   :  { %v605_v50 = vpop.xlane.xlu0 %604 }
 0x533   :  { %v609_v52 = vsub.f32 %v597_v42, %v605_v50 }
 0x535   :  { %v611_v53 = vmul.f32 1.442695, %v609_v52 }
 0x536   :  { %v608_v54 = vpop.xlane.xlu1 %607 }
 0x537   :  { %v610_v55 = vsub.f32 %v600_v46, %v608_v54  ;;  %1932 = vpow2.f32 %v611_v53  ;;  %v2294_v46 = vld [vmem:[%s2556_s2 + $0x4] ss:$8 sps:$4 sm:$0xff]  }
 0x539   :  { %v613_v56 = vmul.f32 1.442695, %v610_v55 }
 0x53a   :  { %v687_v60 = vpop.permute.xlu1 %686 }
 0x53b   :  { %1934 = vpow2.f32 %v613_v56  ;;  %v692_v61 = vsel %vm295_vm0, %v687_v60, 0 }
 0x53e   :  { %v685_v40 = vpop.permute.xlu1 %684 }
 0x544   :  { %v2234_v57 = vpop.eup %1932 }
 0x548   :  { %v2236_v59 = vpop.eup %1934 }
 0x549   :  { %v621_v35 = vpack.c.bf16 %v2236_v59, %v2234_v57 }
 0x54b   :  { %1751 = vmatmul.mubr.msk.bf16.vlgmr.msra.gmra.mxu1 %vm343_vm2, %v621_v35 }
 0x54c   :  { %1755 = vmatpush3.bf16.xpose.msra.mxu1 %v692_v61  ;;  %1756 = vmatprep.mubr.msk.bf16.mxu1 %vm1990_vm1, %v1988_v1 }
 0x54d   :  { %1760 = vmatprep.subr.bf16.mxu1 %v1988_v1 }
 0x553   :  { %1757 = vmatmul.mubr.msk.bf16.vlgmr.msra.gmra.mxu1 %vm295_vm0, %v685_v40 }
 0x554   :  { %1762 = vmatprep.mubr.msk.bf16.mxu1 %vm1990_vm1, %v1988_v1 }
 0x60b   :  { %v2248_v62 = vpop.f32.mrf.mxu1 }
 0x60d   :  { %v1752_v63 = vpop.f32.mrf.mxu1 }
 0x60f   :  { %v2250_v0 = vpop.f32.mrf.mxu1 }
 0x611   :  { %v1753_v4 = vpop.f32.mrf.mxu1 }
 0x613   :  { %v728_v5 = vpop.f32.mrf.mxu1 }
 0x614   :  { %v729_v6 = vadd.f32 %v728_v5, %v2161_v47 }
 0x615   :  { %v1758_v7 = vpop.f32.mrf.mxu1 }
 0x616   :  { %v735_v9 = vsel %vm343_vm2, %v729_v6, -inf }
 0x617   :  { %736 = vmax.xlane.f32.xlu0 %v735_v9  ;;  %v731_v11 = vpop.f32.mrf.mxu1 }
 0x618   :  { %v732_v12 = vadd.f32 %v731_v11, %v2164_v51 }
 0x619   :  { %v1759_v13 = vpop.f32.mrf.mxu1 }
 0x61a   :  { %v738_v14 = vsel %vm343_vm2, %v732_v12, -inf }
 0x61b   :  { %739 = vmax.xlane.f32.xlu1 %v738_v14 }
 0x62d   :  { %754 = vrot.lane.b32.xlu0 %v2172_v58, %s1992_s28 }
 0x6a0   :  { %v737_v15 = vpop.xlane.xlu0 %736 }
 0x6a1   :  { %v741_v16 = vsub.f32 %v729_v6, %v737_v15 }
 0x6a3   :  { %v743_v17 = vmul.f32 1.442695, %v741_v16 }
 0x6a4   :  { %v740_v18 = vpop.xlane.xlu1 %739  ;;  %v755_v19 = vpop.permute.xlu0 %754 }
 0x6a5   :  { %v742_v20 = vsub.f32 %v732_v12, %v740_v18  ;;  %1761 = vmatpush3.bf16.msra.mxu1 %v755_v19  ;;  %1936 = vpow2.f32 %v743_v17 }
 0x6a6   :  { %1766 = vmatprep.subr.bf16.mxu1 %v1988_v1 }
 0x6a7   :  { %v745_v21 = vmul.f32 1.442695, %v742_v20 }
 0x6a9   :  { %1938 = vpow2.f32 %v745_v21 }
 0x6b2   :  { %v2264_v23 = vpop.eup %1936 }
 0x6b6   :  { %v2266_v58 = vpop.eup %1938 }
 0x6b7   :  { %v753_v24 = vpack.c.bf16 %v2266_v58, %v2264_v23 }
 0x6b9   :  { %1763 = vmatmul.mubr.msk.bf16.vlgmr.msra.gmra.mxu1 %vm343_vm2, %v753_v24 }
 0x6ba   :  { %1767 = vmatpush3.bf16.xpose.msra.mxu1 %v823_v25  ;;  %1768 = vmatprep.mubr.msk.bf16.mxu1 %vm1990_vm1, %v1988_v1 }
 0x6bb   :  { %1772 = vmatprep.subr.bf16.mxu1 %v1988_v1 }
 0x6c1   :  { %1769 = vmatmul.mubr.msk.bf16.vlgmr.msra.gmra.mxu1 %vm295_vm0, %v2277_v29 }
 0x6c2   :  { %1774 = vmatprep.mubr.msk.bf16.mxu1 %vm1990_vm1, %v1988_v1  ;;  %1773 = vmatpush3.bf16.msra.mxu1 %v2294_v46 }
 0x6c3   :  { %1778 = vmatprep.subr.bf16.mxu1 %v1988_v1 }
 0x779   :  { %v2283_v30 = vpop.f32.mrf.mxu1 }
 0x77b   :  { %v1764_v31 = vpop.f32.mrf.mxu1 }
 0x77d   :  { %v2285_v32 = vpop.f32.mrf.mxu1 }
 0x77f   :  { %v1765_v33 = vpop.f32.mrf.mxu1 }
 0x781   :  { %v859_v36 = vpop.f32.mrf.mxu1 }
 0x782   :  { %v860_v39 = vadd.f32 %v859_v36, %v2161_v47 }
 0x783   :  { %v1770_v41 = vpop.f32.mrf.mxu1 }
 0x784   :  { %v866_v42 = vsel %vm343_vm2, %v860_v39, -inf }
 0x785   :  { %867 = vmax.xlane.f32.xlu0 %v866_v42  ;;  %v862_v38 = vpop.f32.mrf.mxu1 }
 0x786   :  { %v863_v43 = vadd.f32 %v862_v38, %v2164_v51 }
 0x787   :  { %v1771_v44 = vpop.f32.mrf.mxu1 }
 0x788   :  { %v869_v45 = vsel %vm343_vm2, %v863_v43, -inf }
 0x789   :  { %870 = vmax.xlane.f32.xlu1 %v869_v45 }
 0x79a   :  { %942 = vrot.lane.b32.xlu1 %v2262_v22, %s1989_s4 }
 0x79b   :  { %940 = vrot.lane.b32.xlu0 %v2277_v29, %s1989_s4 }
 0x80e   :  { %v868_v48 = vpop.xlane.xlu0 %867 }
 0x80f   :  { %v872_v49 = vsub.f32 %v860_v39, %v868_v48 }
 0x811   :  { %v874_v50 = vmul.f32 1.442695, %v872_v49 }
 0x812   :  { %v871_v52 = vpop.xlane.xlu1 %870  ;;  %v941_v40 = vpop.permute.xlu0 %940 }
 0x813   :  { %v873_v53 = vsub.f32 %v863_v43, %v871_v52  ;;  %1940 = vpow2.f32 %v874_v50 }
 0x815   :  { %v876_v54 = vmul.f32 1.442695, %v873_v53 }
 0x816   :  { %v943_v55 = vpop.permute.xlu1 %942 }
 0x817   :  { %1942 = vpow2.f32 %v876_v54  ;;  %v948_v61 = vsel %vm295_vm0, %v943_v55, 0 }
 0x820   :  { %v2302_v56 = vpop.eup %1940 }
 0x824   :  { %v2304_v60 = vpop.eup %1942 }
 0x825   :  { %v884_v35 = vpack.c.bf16 %v2304_v60, %v2302_v56 }
 0x827   :  { %1775 = vmatmul.mubr.msk.bf16.vlgmr.msra.gmra.mxu1 %vm343_vm2, %v884_v35 }
 0x828   :  { %1779 = vmatpush3.bf16.xpose.msra.mxu1 %v948_v61  ;;  %1780 = vmatprep.mubr.msk.bf16.mxu1 %vm1990_vm1, %v1988_v1 }
 0x829   :  { %1784 = vmatprep.subr.bf16.mxu1 %v1988_v1 }
 0x82f   :  { %1781 = vmatmul.mubr.msk.bf16.vlgmr.msra.gmra.mxu1 %vm295_vm0, %v941_v40 }
 0x830   :  { %1786 = vmatprep.mubr.msk.bf16.mxu1 %vm1990_vm1, %v1988_v1 }
 0x8e7   :  { %v2316_v63 = vpop.f32.mrf.mxu1 }
 0x8e9   :  { %v1776_v4 = vpop.f32.mrf.mxu1 }
 0x8eb   :  { %v2318_v5 = vpop.f32.mrf.mxu1 }
 0x8ed   :  { %v1777_v6 = vpop.f32.mrf.mxu1 }
 0x8ef   :  { %v984_v7 = vpop.f32.mrf.mxu1 }
 0x8f0   :  { %v985_v9 = vadd.f32 %v984_v7, %v2161_v47 }
 0x8f1   :  { %v1782_v11 = vpop.f32.mrf.mxu1 }
 0x8f2   :  { %v991_v12 = vsel %vm343_vm2, %v985_v9, -inf }
 0x8f3   :  { %992 = vmax.xlane.f32.xlu1 %v991_v12  ;;  %v987_v13 = vpop.f32.mrf.mxu1 }
 0x8f4   :  { %v988_v14 = vadd.f32 %v987_v13, %v2164_v51 }
 0x8f5   :  { %v1783_v15 = vpop.f32.mrf.mxu1 }
 0x8f6   :  { %v994_v16 = vsel %vm343_vm2, %v988_v14, -inf }
 0x8f7   :  { %995 = vmax.xlane.f32.xlu0 %v994_v16 }
 0x904   :  { %1010 = vrot.lane.b32.xlu1 %v2294_v46, %s1989_s4 }
 0x908   :  { %1071 = vrot.lane.b32.xlu1 %v2277_v29, %s1991_s27 }
 0x90d   :  { %1073 = vrot.lane.b32.xlu0 %v2262_v22, %s1991_s27 }
 0x97c   :  { %v993_v17 = vpop.xlane.xlu1 %992 }
 0x97d   :  { %v997_v18 = vsub.f32 %v985_v9, %v993_v17 }
 0x97f   :  { %v999_v19 = vmul.f32 1.442695, %v997_v18 }
 0x980   :  { %v1011_v20 = vpop.permute.xlu1 %1010  ;;  %v996_v21 = vpop.xlane.xlu0 %995 }
 0x981   :  { %v998_v24 = vsub.f32 %v988_v14, %v996_v21  ;;  %1785 = vmatpush3.bf16.msra.mxu1 %v1011_v20  ;;  %1944 = vpow2.f32 %v999_v19 }
 0x982   :  { %1790 = vmatprep.subr.bf16.mxu1 %v1988_v1 }
 0x983   :  { %v1001_v25 = vmul.f32 1.442695, %v998_v24 }
 0x984   :  { %v1074_v26 = vpop.permute.xlu0 %1073  ;;  %v1072_v41 = vpop.permute.xlu1 %1071 }
 0x985   :  { %1946 = vpow2.f32 %v1001_v25  ;;  %v1079_v36 = vsel %vm295_vm0, %v1074_v26, 0 }
 0x98e   :  { %v2331_v31 = vpop.eup %1944 }
 0x992   :  { %v2333_v33 = vpop.eup %1946 }
 0x993   :  { %v1009_v39 = vpack.c.bf16 %v2333_v33, %v2331_v31 }
 0x995   :  { %1787 = vmatmul.mubr.msk.bf16.vlgmr.msra.gmra.mxu1 %vm343_vm2, %v1009_v39 }
 0x996   :  { %1791 = vmatpush3.bf16.xpose.msra.mxu1 %v1079_v36  ;;  %1792 = vmatprep.mubr.msk.bf16.mxu1 %vm1990_vm1, %v1988_v1 }
 0x997   :  { %1796 = vmatprep.subr.bf16.mxu1 %v1988_v1 }
 0x99d   :  { %1793 = vmatmul.mubr.msk.bf16.vlgmr.msra.gmra.mxu1 %vm295_vm0, %v1072_v41  ;;  %v1006_v41 = vsel %vm343_vm2, %v2333_v33, 0.0  ;;  %v618_v33 = vsel %vm343_vm2, %v2236_v59, 0.0 }
 0x99e   :  { %1798 = vmatprep.mubr.msk.bf16.mxu1 %vm1990_vm1, %v1988_v1 }
 0xa55   :  { %v2345_v42 = vpop.f32.mrf.mxu1 }
 0xa57   :  { %v1788_v38 = vpop.f32.mrf.mxu1 }
 0xa59   :  { %v2347_v43 = vpop.f32.mrf.mxu1 }
 0xa5b   :  { %v1789_v44 = vpop.f32.mrf.mxu1 }
 0xa5c   :  { %v881_v44 = vsel %vm343_vm2, %v2304_v60, 0.0 }
 0xa5d   :  { %v1115_v45 = vpop.f32.mrf.mxu1 }
 0xa5e   :  { %v1116_v48 = vadd.f32 %v1115_v45, %v2161_v47 }
 0xa5f   :  { %v1794_v49 = vpop.f32.mrf.mxu1 }
 0xa60   :  { %v1122_v50 = vsel %vm343_vm2, %v1116_v48, -inf }
 0xa61   :  { %1123 = vmax.xlane.f32.xlu1 %v1122_v50  ;;  %v1118_v52 = vpop.f32.mrf.mxu1 }
 0xa62   :  { %v1119_v53 = vadd.f32 %v1118_v52, %v2164_v51 }
 0xa63   :  { %v1795_v54 = vpop.f32.mrf.mxu1 }
 0xa64   :  { %v1125_v55 = vsel %vm343_vm2, %v1119_v53, -inf }
 0xa65   :  { %1126 = vmax.xlane.f32.xlu0 %v1125_v55 }
 0xa72   :  { %1141 = vrot.lane.b32.xlu1 %v2294_v46, %s1991_s27 }
 0xa76   :  { %1202 = vrot.lane.b32.xlu1 %v2277_v29, %s1992_s28 }
 0xa7b   :  { %1204 = vrot.lane.b32.xlu0 %v2262_v22, %s1992_s28 }
 0xaea   :  { %v1124_v61 = vpop.xlane.xlu1 %1123 }
 0xaeb   :  { %v1128_v35 = vsub.f32 %v1116_v48, %v1124_v61 }
 0xaed   :  { %v1130_v40 = vmul.f32 1.442695, %v1128_v35 }
 0xaee   :  { %v1142_v4 = vpop.permute.xlu1 %1141  ;;  %v1127_v6 = vpop.xlane.xlu0 %1126 }
 0xaef   :  { %v1129_v7 = vsub.f32 %v1119_v53, %v1127_v6  ;;  %1797 = vmatpush3.bf16.msra.mxu1 %v1142_v4  ;;  %1948 = vpow2.f32 %v1130_v40  ;;  %v750_v4 = vsel %vm343_vm2, %v2266_v58, 0.0 }
 0xaf0   :  { %1802 = vmatprep.subr.bf16.mxu1 %v1988_v1 }
 0xaf1   :  { %v1132_v9 = vmul.f32 1.442695, %v1129_v7 }
 0xaf2   :  { %v1205_v11 = vpop.permute.xlu0 %1204  ;;  %v1203_v22 = vpop.permute.xlu1 %1202 }
 0xaf3   :  { %1950 = vpow2.f32 %v1132_v9  ;;  %v1210_v29 = vsel %vm295_vm0, %v1205_v11, 0  ;;  %v878_v9 = vsel %vm343_vm2, %v2302_v56, 0.0 }
 0xafc   :  { %v1949_v12 = vpop.eup %1948 }
 0xb00   :  { %v1951_v13 = vpop.eup %1950 }
 0xb01   :  { %v1140_v14 = vpack.c.bf16 %v1951_v13, %v1949_v12  ;;  %v1137_v38 = vsel %vm343_vm2, %v1951_v13, 0.0  ;;  %v356_v13 = vsel %vm343_vm2, %v2176_v2, 0.0 }
 0xb03   :  { %1799 = vmatmul.mubr.msk.bf16.vlgmr.msra.gmra.mxu1 %vm343_vm2, %v1140_v14 }
 0xb04   :  { %1803 = vmatpush3.bf16.xpose.msra.mxu1 %v1210_v29  ;;  %1804 = vmatprep.mubr.msk.bf16.mxu1 %vm1990_vm1, %v1988_v1 }
 0xb05   :  { %1808 = vmatprep.subr.bf16.mxu1 %v1988_v1 }
 0xb0b   :  { %1805 = vmatmul.mubr.msk.bf16.vlgmr.msra.gmra.mxu1 %vm295_vm0, %v1203_v22 }
 0xb0c   :  { %1810 = vmatprep.mubr.msk.bf16.mxu1 %vm1990_vm1, %v1988_v1  ;;  %v1003_v1 = vsel %vm343_vm2, %v2331_v31, 0.0  ;;  %v615_v31 = vsel %vm343_vm2, %v2234_v57, 0.0  ;;  %v359_v57 = vsel %vm343_vm2, %v2178_v3, 0.0 }
 0xbc3   :  { %v2368_v15 = vpop.f32.mrf.mxu1 }
 0xbc5   :  { %v1800_v16 = vpop.f32.mrf.mxu1 }
 0xbc7   :  { %v2370_v17 = vpop.f32.mrf.mxu1 }
 0xbc9   :  { %v1801_v18 = vpop.f32.mrf.mxu1 }
 0xbcb   :  { %v1246_v19 = vpop.f32.mrf.mxu1 }
 0xbcc   :  { %v1247_v20 = vadd.f32 %v1246_v19, %v2161_v47  ;;  %v483_v47 = vsel %vm343_vm2, %v2207_v27, 0.0  ;;  %v747_v27 = vsel %vm343_vm2, %v2264_v23, 0.0 }
 0xbcd   :  { %v1806_v21 = vpop.f32.mrf.mxu1 }
 0xbce   :  { %v1253_v24 = vsel %vm343_vm2, %v1247_v20, -inf }
 0xbcf   :  { %1254 = vmax.xlane.f32.xlu1 %v1253_v24  ;;  %v1249_v25 = vpop.f32.mrf.mxu1 }
 0xbd0   :  { %v1250_v26 = vadd.f32 %v1249_v25, %v2164_v51  ;;  %v1134_v51 = vsel %vm343_vm2, %v1949_v12, 0.0 }
 0xbd1   :  { %v1807_v36 = vpop.f32.mrf.mxu1 }
 0xbd2   :  { %v1256_v39 = vsel %vm343_vm2, %v1250_v26, -inf }
 0xbd3   :  { %1257 = vmax.xlane.f32.xlu0 %v1256_v39 }
 0xbd7   :  { %1004 = vadd.xlane.f32.xlu0 %v1003_v1 }
 0xbdb   :  { %1007 = vadd.xlane.f32.xlu0 %v1006_v41  ;;  %v1882_v41 = vld [vmem:[%s2557_s5 + $0x50] ss:$8 sps:$4 sm:$0xff]  }
 0xbdf   :  { %484 = vadd.xlane.f32.xlu0 %v483_v47  ;;  %v1887_v47 = vld [vmem:[%s2557_s5 + $0x44] ss:$8 sps:$4 sm:$0xff]  }
 0xbe0   :  { %1272 = vrot.lane.b32.xlu1 %v2294_v46, %s1992_s28  ;;  %v486_v46 = vsel %vm343_vm2, %v2209_v28, 0.0 }
 0xbe3   :  { %1135 = vadd.xlane.f32.xlu0 %v1134_v51  ;;  %v1885_v51 = vld [vmem:[%s2557_s5 + $0x40] ss:$8 sps:$4 sm:$0xff]  }
 0xbe7   :  { %1138 = vadd.xlane.f32.xlu0 %v1137_v38  ;;  %v1890_v38 = vld [vmem:[%s2557_s5 + $0x34] ss:$8 sps:$4 sm:$0xff]  }
 0xbeb   :  { %616 = vadd.xlane.f32.xlu0 %v615_v31  ;;  %v1888_v31 = vld [vmem:[%s2557_s5 + $0x30] ss:$8 sps:$4 sm:$0xff]  }
 0xbef   :  { %619 = vadd.xlane.f32.xlu0 %v618_v33  ;;  %v1893_v33 = vld [vmem:[%s2557_s5 + $0x24] ss:$8 sps:$4 sm:$0xff]  }
 0xbf3   :  { %748 = vadd.xlane.f32.xlu0 %v747_v27  ;;  %v1891_v27 = vld [vmem:[%s2557_s5 + $0x20] ss:$8 sps:$4 sm:$0xff]  }
 0xc04   :  { %487 = vadd.xlane.f32.xlu1 %v486_v46  ;;  %v1896_v46 = vld [vmem:[%s2557_s5 + $0x14] ss:$8 sps:$4 sm:$0xff]  }
 0xc08   :  { %882 = vadd.xlane.f32.xlu1 %v881_v44  ;;  %v1894_v44 = vld [vmem:[%s2557_s5 + $0x10] ss:$8 sps:$4 sm:$0xff]  }
 0xc0c   :  { %360 = vadd.xlane.f32.xlu1 %v359_v57  ;;  %v1899_v57 = vld [vmem:[%s2557_s5 + $0x4] ss:$8 sps:$4 sm:$0xff]  }
 0xc58   :  { %v1255_v45 = vpop.xlane.xlu1 %1254 }
 0xc59   :  { %v1259_v48 = vsub.f32 %v1247_v20, %v1255_v45  ;;  %v1897_v45 = vld [vmem:[%s2557_s5] ss:$8 sps:$4 sm:$0xff]  }
 0xc5b   :  { %v1261_v59 = vmul.f32 1.442695, %v1259_v48  ;;  %v1902_v48 = vld [vmem:[%s2557_s5 + $0xf4] ss:$8 sps:$4 sm:$0xff]  }
 0xc5c   :  { %v1258_v49 = vpop.xlane.xlu0 %1257  ;;  %v1273_v50 = vpop.permute.xlu1 %1272 }
 0xc5d   :  { %1952 = vpow2.f32 %v1261_v59  ;;  %v1260_v23 = vsub.f32 %v1250_v26, %v1258_v49  ;;  %1809 = vmatpush3.bf16.msra.mxu1 %v1273_v50  ;;  %v1900_v59 = vld [vmem:[%s2557_s5 + $0xf0] ss:$8 sps:$4 sm:$0xff]   ;;  %v1905_v49 = vld [vmem:[%s2557_s5 + $0xe4] ss:$8 sps:$4 sm:$0xff]   ;;  %v1903_v50 = vld [vmem:[%s2557_s5 + $0xe0] ss:$8 sps:$4 sm:$0xff]  }
 0xc5f   :  { %v1263_v52 = vmul.f32 1.442695, %v1260_v23  ;;  %v1908_v23 = vld [vmem:[%s2557_s5 + $0xd4] ss:$8 sps:$4 sm:$0xff]  }
 0xc60   :  { %v1005_v53 = vpop.xlane.xlu0 %1004 }
 0xc61   :  { %1954 = vpow2.f32 %v1263_v52  ;;  %v1906_v52 = vld [vmem:[%s2557_s5 + $0xd0] ss:$8 sps:$4 sm:$0xff]  }
 0xc64   :  { %v1008_v28 = vpop.xlane.xlu0 %1007 }
 0xc65   :  { %1956 = vrcp.f32 %v1008_v28 }
 0xc68   :  { %v485_v54 = vpop.xlane.xlu0 %484 }
 0xc69   :  { %1958 = vrcp.f32 %v485_v54  ;;  %v1909_v54 = vld [vmem:[%s2557_s5 + $0xc0] ss:$8 sps:$4 sm:$0xff]  }
 0xc6a   :  { %v1953_v60 = vpop.eup %1952  ;;  %1960 = vrcp.f32 %v1005_v53  ;;  %v1911_v53 = vld [vmem:[%s2557_s5 + $0xc4] ss:$8 sps:$4 sm:$0xff]  }
 0xc6b   :  { %v1265_v55 = vsel %vm343_vm2, %v1953_v60, 0.0 }
 0xc6c   :  { %1266 = vadd.xlane.f32.xlu0 %v1265_v55  ;;  %v1136_v12 = vpop.xlane.xlu0 %1135 }
 0xc6d   :  { %1962 = vrcp.f32 %v1136_v12 }
 0xc6e   :  { %v1955_v3 = vpop.eup %1954 }
 0xc6f   :  { %v1268_v61 = vsel %vm343_vm2, %v1955_v3, 0.0  ;;  %v1271_v35 = vpack.c.bf16 %v1955_v3, %v1953_v60 }
 0xc70   :  { %1269 = vadd.xlane.f32.xlu0 %v1268_v61  ;;  %v1139_v58 = vpop.xlane.xlu0 %1138 }
 0xc71   :  { %1811 = vmatmul.mubr.msk.bf16.vlgmr.msra.gmra.mxu1 %vm343_vm2, %v1271_v35 }
 0xc72   :  { %v1957_v40 = vpop.eup %1956 }
 0xc73   :  { %v1060_v6 = vmul.f32 %v1957_v40, %v2347_v43 }
 0xc74   :  { %751 = vadd.xlane.f32.xlu0 %v750_v4  ;;  %v617_v43 = vpop.xlane.xlu0 %616 }
 0xc75   :  { %1065 = vrot.lane.b32.xlu1 %v1060_v6, %s1992_s28  ;;  %1964 = vrcp.f32 %v617_v43 }
 0xc76   :  { %v1959_v7 = vpop.eup %1958 }
 0xc77   :  { %v539_v11 = vmul.f32 %v1959_v7, %v2222_v34  ;;  %v1961_v29 = vpop.eup %1960 }
 0xc78   :  { %879 = vadd.xlane.f32.xlu0 %v878_v9  ;;  %v1059_v56 = vmul.f32 %v1961_v29, %v2345_v42  ;;  %v620_v22 = vpop.xlane.xlu0 %619 }
 0xc79   :  { %543 = vrot.lane.b32.xlu1 %v539_v11, %s1992_s28 }
 0xc7a   :  { %v1963_v34 = vpop.eup %1962 }
 0xc7b   :  { %v1190_v2 = vmul.f32 %v1963_v34, %v2368_v15  ;;  %v1917_v34 = vld [vmem:[%s2557_s5 + $0xa4] ss:$8 sps:$4 sm:$0xff]  }
 0xc7c   :  { %357 = vadd.xlane.f32.xlu0 %v356_v13  ;;  %v749_v60 = vpop.xlane.xlu0 %748 }
 0xc82   :  { %v1965_v18 = vpop.eup %1964 }
 0xc83   :  { %v671_v20 = vmul.f32 %v1965_v18, %v2248_v62 }
 0xc8d   :  { %v488_v14 = vpop.xlane.xlu1 %487 }
 0xc8e   :  { %1966 = vrcp.f32 %v488_v14  ;;  %v1912_v14 = vld [vmem:[%s2557_s5 + $0xb0] ss:$8 sps:$4 sm:$0xff]  }
 0xc8f   :  { %1968 = vrcp.f32 %v1139_v58 }
 0xc91   :  { %v883_v16 = vpop.xlane.xlu1 %882 }
 0xc92   :  { %1970 = vrcp.f32 %v883_v16  ;;  %1063 = vrot.lane.b32.xlu0 %v1059_v56, %s1992_s28  ;;  %v1915_v56 = vld [vmem:[%s2557_s5 + $0xa0] ss:$8 sps:$4 sm:$0xff]   ;;  %v1920_v16 = vld [vmem:[%s2557_s5 + $0x94] ss:$8 sps:$4 sm:$0xff]  }
 0xc93   :  { %1972 = vrcp.f32 %v620_v22  ;;  %v1918_v22 = vld [vmem:[%s2557_s5 + $0x90] ss:$8 sps:$4 sm:$0xff]  }
 0xc95   :  { %v361_v19 = vpop.xlane.xlu1 %360 }
 0xc96   :  { %1974 = vrcp.f32 %v361_v19  ;;  %1194 = vrot.lane.b32.xlu0 %v1190_v2, %s1991_s27  ;;  %v1923_v2 = vld [vmem:[%s2557_s5 + $0x84] ss:$8 sps:$4 sm:$0xff]  }
 0xc9a   :  { %675 = vrot.lane.b32.xlu0 %v671_v20, %s1991_s27 }
 0xc9b   :  { %v1967_v21 = vpop.eup %1966 }
 0xc9c   :  { %v540_v42 = vmul.f32 %v1967_v21, %v2224_v37  ;;  %v1969_v24 = vpop.eup %1968  ;;  %v1876_v37 = vld [vmem:[%s2557_s5 + $0x70] ss:$8 sps:$4 sm:$0xff]   ;;  %v1921_v21 = vld [vmem:[%s2557_s5 + $0x80] ss:$8 sps:$4 sm:$0xff]  }
 0xc9d   :  { %v1191_v26 = vmul.f32 %v1969_v24, %v2370_v17  ;;  %v1881_v17 = vld [vmem:[%s2557_s5 + $0x64] ss:$8 sps:$4 sm:$0xff]  }
 0xc9e   :  { %545 = vrot.lane.b32.xlu1 %v540_v42, %s1992_s28 }
 0xc9f   :  { %v1971_v25 = vpop.eup %1970 }
 0xca0   :  { %v936_v15 = vmul.f32 %v1971_v25, %v2318_v5  ;;  %v1973_v36 = vpop.eup %1972  ;;  %v1878_v5 = vld [vmem:[%s2557_s5 + $0x74] ss:$8 sps:$4 sm:$0xff]  }
 0xca1   :  { %v672_v62 = vmul.f32 %v1973_v36, %v2250_v0  ;;  %1543 = vmatprep.subr.bf16.mxu0 %v1878_v5  ;;  %v1884_v0 = vld [vmem:[%s2557_s5 + $0x54] ss:$8 sps:$4 sm:$0xff]  }
 0xca2   :  { %1196 = vrot.lane.b32.xlu1 %v1191_v26, %s1991_s27  ;;  %938 = vst.msk [vmem:[#allocation2 + $0x18] sm:$0xff] %vm295_vm0, %v936_v15  ;;  %1544 = vmatpush1.bf16.msra.mxu0 %v1876_v37 }
 0xca3   :  { %v1975_v39 = vpop.eup %1974  ;;  %1545 = vmatprep.subr.bf16.mxu0 %v1881_v17 }
 0xca4   :  { %v416_v1 = vmul.f32 %v1975_v39, %v2192_v10  ;;  %v1879_v10 = vld [vmem:[%s2557_s5 + $0x60] ss:$8 sps:$4 sm:$0xff]  }
 0xca6   :  { %677 = vrot.lane.b32.xlu1 %v672_v62, %s1991_s27  ;;  %418 = vst.msk [vmem:[#allocation2 + $0x10] sm:$0xff] %vm295_vm0, %v416_v1  ;;  %1546 = vmatpush1.bf16.msra.mxu0 %v1879_v10 }
 0xca7   :  { %1547 = vmatprep.subr.bf16.mxu0 %v1884_v0 }
 0xcaa   :  { %1548 = vmatpush1.bf16.msra.mxu0 %v1882_v41 }
 0xcab   :  { %1549 = vmatprep.subr.bf16.mxu0 %v1887_v47 }
 0xcae   :  { %1550 = vmatpush1.bf16.msra.mxu0 %v1885_v51 }
 0xcaf   :  { %1551 = vmatprep.subr.bf16.mxu0 %v1890_v38 }
 0xcb2   :  { %1552 = vmatpush1.bf16.msra.mxu0 %v1888_v31 }
 0xcb3   :  { %1553 = vmatprep.subr.bf16.mxu0 %v1893_v33 }
 0xcb6   :  { %1554 = vmatpush1.bf16.msra.mxu0 %v1891_v27  ;;  %v1371_v27 = vld [vmem:[%s2558_s6] sm:$0x3] }
 0xcb7   :  { %1555 = vmatprep.subr.bf16.mxu0 %v1896_v46 }
 0xcba   :  { %1556 = vmatpush1.bf16.msra.mxu0 %v1894_v44 }
 0xcbb   :  { %1557 = vmatprep.subr.bf16.mxu0 %v1899_v57 }
 0xcbe   :  { %1558 = vmatpush1.bf16.msra.mxu0 %v1897_v45 }
 0xcbf   :  { %1559 = vmatprep.subr.bf16.mxu0 %v1902_v48 }
 0xcc2   :  { %1560 = vmatpush2.bf16.msra.mxu0 %v1900_v59 }
 0xcc3   :  { %1561 = vmatprep.subr.bf16.mxu0 %v1905_v49 }
 0xcc6   :  { %1562 = vmatpush2.bf16.msra.mxu0 %v1903_v50 }
 0xcc7   :  { %1563 = vmatprep.subr.bf16.mxu0 %v1908_v23 }
 0xcca   :  { %1564 = vmatpush2.bf16.msra.mxu0 %v1906_v52 }
 0xccb   :  { %1565 = vmatprep.subr.bf16.mxu0 %v1911_v53 }
 0xcce   :  { %1566 = vmatpush2.bf16.msra.mxu0 %v1909_v54 }
 0xce7   :  { %v1066_v28 = vpop.permute.xlu1 %1065 }
 0xce8   :  { %1070 = vst.msk [vmem:[#allocation2 + $0x18] sm:$0xff] %vm549_vm3, %v1066_v28 }
 0xceb   :  { %v544_v6 = vpop.permute.xlu1 %543 }
 0xcf5   :  { %v1267_v55 = vpop.xlane.xlu0 %1266 }
 0xcf9   :  { %v1270_v3 = vpop.xlane.xlu0 %1269 }
 0xcfd   :  { %v752_v61 = vpop.xlane.xlu0 %751 }
 0xd01   :  { %v880_v35 = vpop.xlane.xlu0 %879 }
 0xd02   :  { %1976 = vrcp.f32 %v880_v35 }
 0xd05   :  { %v358_v40 = vpop.xlane.xlu0 %357 }
 0xd06   :  { %1978 = vrcp.f32 %v358_v40 }
 0xd07   :  { %1980 = vrcp.f32 %v1267_v55 }
 0xd08   :  { %1982 = vrcp.f32 %v749_v60 }
 0xd09   :  { %v1064_v4 = vpop.permute.xlu0 %1063  ;;  %1984 = vrcp.f32 %v1270_v3 }
 0xd0a   :  { %1986 = vrcp.f32 %v752_v61 }
 0xd0d   :  { %v1195_v12 = vpop.permute.xlu0 %1194 }
 0xd0f   :  { %v1977_v7 = vpop.eup %1976 }
 0xd10   :  { %v935_v9 = vmul.f32 %v1977_v7, %v2316_v63  ;;  %v546_v11 = vpop.permute.xlu1 %545 }
 0xd11   :  { %551 = vst.msk [vmem:[#allocation2 + $0x10] sm:$0xff] %vm549_vm3, %v546_v11  ;;  %v676_v63 = vpop.permute.xlu0 %675 }
 0xd12   :  { %937 = vst.msk [vmem:[#allocation2 + $0x8] sm:$0xff] %vm295_vm0, %v935_v9 }
 0xd13   :  { %v1979_v13 = vpop.eup %1978  ;;  %1069 = vst.msk [vmem:[#allocation2 + $0x8] sm:$0xff] %vm549_vm3, %v1064_v4 }
 0xd14   :  { %1200 = vst.msk [vmem:[#allocation2 + $0x8] sm:$0xff] %vm681_vm4, %v1195_v12  ;;  %v415_v58 = vmul.f32 %v1979_v13, %v2190_v8  ;;  %v1197_v43 = vpop.permute.xlu1 %1196  ;;  %v1914_v8 = vld [vmem:[%s2557_s5 + $0xb4] ss:$8 sps:$4 sm:$0xff]   ;;  %v1981_v18 = vpop.eup %1980 }
 0xd15   :  { %1201 = vst.msk [vmem:[#allocation2 + $0x18] sm:$0xff] %vm681_vm4, %v1197_v43  ;;  %1567 = vmatprep.subr.bf16.mxu0 %v1914_v8  ;;  %v1983_v42 = vpop.eup %1982 }
 0xd16   :  { %417 = vst.msk [vmem:[#allocation2] sm:$0xff] %vm295_vm0, %v415_v58  ;;  %1568 = vmatpush2.bf16.msra.mxu0 %v1912_v14  ;;  %v1985_v25 = vpop.eup %1984  ;;  %v803_v36 = vmul.f32 %v1983_v42, %v2283_v30 }
 0xd17   :  { %550 = vst.msk [vmem:[#allocation2] sm:$0xff] %vm549_vm3, %v544_v6  ;;  %1569 = vmatprep.subr.bf16.mxu0 %v1917_v34  ;;  %v1987_v39 = vpop.eup %1986 }
 0xd18   :  { %682 = vst.msk [vmem:[#allocation2] sm:$0xff] %vm681_vm4, %v676_v63  ;;  %v678_v29 = vpop.permute.xlu1 %677  ;;  %v804_v1 = vmul.f32 %v1987_v39, %v2285_v32  ;;  %v1373_v32 = vlaneseq }
 0xd19   :  { %683 = vst.msk [vmem:[#allocation2 + $0x10] sm:$0xff] %vm681_vm4, %v678_v29 }
 0xd1a   :  { %1570 = vmatpush2.bf16.msra.mxu0 %v1915_v56  ;;  %v1374_v31 = vshrl.u32 %v1373_v32, 7 }
 0xd1b   :  { %1571 = vmatprep.subr.bf16.mxu0 %v1920_v16 }
 0xd1c   :  { %v1375_v33 = vsub.s32 0, %v1374_v31  ;;  %v1379_v46 = vsub.s32 1, %v1374_v31 }
 0xd1e   :  { %1572 = vmatpush2.bf16.msra.mxu0 %v1918_v22  ;;  %v1376_v44 = vrot.slane %v1371_v27, %v1375_v33  ;;  %v1380_v57 = vrot.slane %v1371_v27, %v1379_v46 }
 0xd1f   :  { %1573 = vmatprep.subr.bf16.mxu0 %v1923_v2 }
 0xd22   :  { %1574 = vmatpush2.bf16.msra.mxu0 %v1921_v21 }
 0xd31   :  { %v1312_v19 = vpop.f32.mrf.mxu1 }
 0xd32   :  { %v1321_v20 = vmul.f32 %v1981_v18, %v1312_v19 }
 0xd33   :  { %v1812_v24 = vpop.f32.mrf.mxu1 }
 0xd34   :  { %1325 = vrot.lane.b32.xlu0 %v1321_v20, %s1989_s4 }
 0xd35   :  { %v1315_v26 = vpop.f32.mrf.mxu1 }
 0xd36   :  { %v1322_v15 = vmul.f32 %v1985_v25, %v1315_v26 }
 0xd37   :  { %v1813_v62 = vpop.f32.mrf.mxu1 }
 0xd38   :  { %807 = vrot.lane.b32.xlu0 %v803_v36, %s1989_s4  ;;  %1327 = vrot.lane.b32.xlu1 %v1322_v15, %s1989_s4 }
 0xd3c   :  { %809 = vrot.lane.b32.xlu1 %v804_v1, %s1989_s4 }
 0xda6   :  { %v1326_v37 = vpop.permute.xlu0 %1325 }
 0xda7   :  { %1331 = vst.msk [vmem:[#allocation2 + $0x8] sm:$0xff] %vm813_vm5, %v1326_v37 }
 0xdaa   :  { %v808_v5 = vpop.permute.xlu0 %807  ;;  %v1328_v17 = vpop.permute.xlu1 %1327 }
 0xdab   :  { %814 = vst.msk [vmem:[#allocation2] sm:$0xff] %vm813_vm5, %v808_v5  ;;  %1332 = vst.msk [vmem:[#allocation2 + $0x18] sm:$0xff] %vm813_vm5, %v1328_v17 }
 0xdae   :  { %v810_v10 = vpop.permute.xlu1 %809  ;;  %v1334_v30 = vld [vmem:[#allocation2 + $0x8] sm:$0xff] }
 0xdaf   :  { %815 = vst.msk [vmem:[#allocation2 + $0x10] sm:$0xff] %vm813_vm5, %v810_v10 }
 0xdb2   :  { %v1336_v0 = vld [vmem:[#allocation2 + $0x18] sm:$0xff]  ;;  %v1333_v47 = vld [vmem:[#allocation2] sm:$0xff] }
 0xdb3   :  { %v1338_v41 = vpack.c.bf16 %v1336_v0, %v1334_v30 }
 0xdb5   :  { %1575 = vmatprep.mubr.bf16.mxu0 %v1338_v41 }
 0xdb6   :  { %v1335_v51 = vld [vmem:[#allocation2 + $0x10] sm:$0xff] }
 0xdb7   :  { %v1337_v38 = vpack.c.bf16 %v1335_v51, %v1333_v47 }
 0xdb9   :  { %1576 = vmatmul.mubr.bf16.vlgmr.msra.gmra.mxu0 %v1337_v38 }
 0xe79   :  { %v1577_v45 = vpop.f32.mrf.mxu0 }
 0xe7a   :  { %v1578_v48 = vadd.f32 %v1577_v45, %v1376_v44 }
 0xe7b   :  { %v1579_v59 = vpop.f32.mrf.mxu0 }
 0xe7c   :  { %1586 = vst [vmem:[%s2559_s7] sm:$0xff] %v1578_v48  ;;  %v1580_v49 = vadd.f32 %v1579_v59, %v1380_v57 }
 0xe7d   :  { %v1581_v50 = vpop.f32.mrf.mxu0 }
 0xe7e   :  { %1587 = vst [vmem:[%s2559_s7 + $0x8] sm:$0xff] %v1580_v49  ;;  %v1582_v23 = vadd.f32 %v1581_v50, %v1376_v44 }
 0xe7f   :  { %v1583_v52 = vpop.f32.mrf.mxu0 }
 0xe80   :  { %1588 = vst [vmem:[%s2559_s7 + $0x10] sm:$0xff] %v1582_v23  ;;  %v1584_v53 = vadd.f32 %v1583_v52, %v1380_v57 }
 0xe82   :  { %1589 = vst [vmem:[%s2559_s7 + $0x18] sm:$0xff] %v1584_v53 }

</bundles_post_ra>
